<compile_context>
chip_gen: v6e
topology: v6e:2x2x1
jax: 0.10.0
libtpu: 0.0.40
codegen_flags: <defaults>
</compile_context>

<pallas_src>
import functools

import jax
import jax.numpy as jnp
from jax.experimental import pallas as pl
from jax.experimental.pallas import tpu as pltpu


def _round_up(a, b):
    return -(-a // b) * b


def _rvq_kernel(x_ref, cb_ref, ncbt_ref, cbsq_ref, *out_refs,
                num_quantizers, m_valid, needs_mask, emit_residuals):
    """One token tile: run the full residual-VQ cascade over Q codebooks."""
    if emit_residuals:
        qout_ref, idx_ref, loss_ref, res_ref = out_refs
    else:
        qout_ref, idx_ref, loss_ref = out_refs
        res_ref = None

    Q = num_quantizers
    TM, D = x_ref.shape
    C = cb_ref.shape[1]
    cb_dtype = cb_ref.dtype       # gather matmul runs in the codebook's native dtype
    dist_dtype = ncbt_ref.dtype   # distance matmul operand dtype (f32 unless flagged)

    residual = x_ref[...].astype(jnp.float32)                 # (TM, D)
    quantized_out = jnp.zeros((TM, D), jnp.float32)

    # Hoisted iotas (JAX does not CSE broadcast_in_dim; build them once).
    lane = jax.lax.broadcasted_iota(jnp.int32, (TM, C), 1)    # one-hot lane ids
    loss_row = jax.lax.broadcasted_iota(jnp.int32, (8, 128), 0)
    loss_col = jax.lax.broadcasted_iota(jnp.int32, (8, 128), 1)
    loss_acc = jnp.zeros((8, 128), jnp.float32)

    if needs_mask:  # token axis was padded to a tile multiple
        row_id = (jax.lax.broadcasted_iota(jnp.int32, (TM, 1), 0)
                  + pl.program_id(0) * TM)
        valid = row_id < m_valid

    idx_rows = []
    for q in range(Q):                                        # static unroll over quantizers
        # residual BEFORE this quantizer (matches all_residuals of the torch module).
        # q == 0 is exactly the input tile and is NOT re-written (stitched in wrapper).
        if emit_residuals and q > 0:
            res_ref[q - 1] = residual.astype(res_ref.dtype)

        # Squared-euclidean distance.  ||residual||^2 is constant per row and does
        # not affect the argmin, so it is omitted.  -2*cb^T and ||cb||^2 were
        # precomputed in the wrapper (one-time XLA ops, not per-tile XLU work).
        dots = jnp.dot(residual.astype(dist_dtype), ncbt_ref[q],
                       preferred_element_type=jnp.float32)    # (TM, C) = r @ (-2 cb)^T
        dist = cbsq_ref[q] + dots                             # (1, C) + (TM, C), f32

        idx = jnp.argmin(dist, axis=-1).astype(jnp.int32)     # (TM,)
        idx_rows.append(idx)

        # Gather codebook rows via one-hot matmul in the codebook's native dtype —
        # exact (the one-hot selects rows) and MXU bf16-native on v6e/v7x.
        onehot = (lane == idx[:, None]).astype(cb_dtype)      # (TM, C)
        quantized = jnp.dot(onehot, cb_ref[q],
                            preferred_element_type=jnp.float32)  # (TM, D) f32
        if needs_mask:
            quantized = jnp.where(valid, quantized, 0.0)      # padded rows contribute nothing

        # commitment-loss numerator for this tile / layer (mean taken in wrapper)
        diff = quantized - residual
        s = jnp.sum(diff * diff)
        loss_acc = loss_acc + jnp.where((loss_row == 0) & (loss_col == q), s, 0.0)

        quantized_out = quantized_out + quantized
        residual = residual - quantized

    qout_ref[...] = quantized_out.astype(qout_ref.dtype)      # (TM, D)
    idx_ref[...] = jnp.stack(idx_rows, axis=0)                # one lane-dense (Q, TM) store
    loss_ref[...] = loss_acc[None]                            # (1, 8, 128) lane-dense


def _estimate_vmem_bytes(tile_m, D, Q, C, x_bytes, cb_bytes, dist_bytes,
                         out_bytes, res_bytes, emit_residuals):
    dbl, single = 2, 1                          # grid-tiled operands double-buffer;
    b = dbl * tile_m * D * x_bytes              # constant-index codebook operands
    b += single * Q * C * D * cb_bytes          # are single-buffered (Buffered(1)).
    b += single * Q * D * C * dist_bytes        # -2 * codebooks^T
    b += single * Q * C * 4                     # ||codebook||^2
    b += dbl * tile_m * D * out_bytes           # quantized_out tile
    b += dbl * Q * tile_m * 4                   # indices tile
    if emit_residuals:
        b += dbl * (Q - 1) * tile_m * D * res_bytes   # residuals tile (dominant output)
    b += dbl * 8 * 128 * 4                      # loss tile
    b += 6 * tile_m * max(C, D) * 4             # transient dist / one-hot / diff temps
    return b


def residual_vq_forward(x, codebooks, *, tile_m=None, commitment_weight=1.0,
                        residuals_dtype=None, return_residuals=True,
                        distance_dtype=jnp.float32, vmem_budget_bytes=None):
    """Eval-mode ResidualVQ forward.

    x: [B, N, D]; codebooks: [Q, C, D].
    residuals_dtype: dtype of the (large) per-layer residual output; pass
      jnp.bfloat16 to halve the dominant HBM write traffic when tolerable.
    return_residuals: False skips the residual output entirely (largest HBM lever).
    distance_dtype: operand dtype of the argmin distance matmul.  f32 (default)
      matches the torch argmin most faithfully; jnp.bfloat16 runs it MXU-native
      (f32 accumulation) at the cost of possible near-tie index flips.
    """
    B, N, D = x.shape
    Q, C, Dc = codebooks.shape
    assert Dc == D, "codebook_dim must equal dim (no projections configured)"
    assert 1 <= Q <= 128
    M = B * N

    out_dtype = x.dtype
    res_dtype = jnp.dtype(residuals_dtype) if residuals_dtype is not None else jnp.dtype(x.dtype)
    dist_dtype = jnp.dtype(distance_dtype)
    emit_res = bool(return_residuals) and Q >= 2   # q=0 residual is just x; never emitted

    xb = jnp.dtype(x.dtype).itemsize
    cbb = jnp.dtype(codebooks.dtype).itemsize
    db = dist_dtype.itemsize
    ob = jnp.dtype(out_dtype).itemsize
    rb = res_dtype.itemsize

    # --- generation-aware VMEM budget (v7x: 64 MiB/TC, v5e/v6e: 128 MiB) ---------
    try:
        vmem_cap = int(getattr(pltpu.get_tpu_info(), "vmem_capacity_bytes", 0)) or (64 * 2**20)
    except Exception:
        vmem_cap = 64 * 2**20                       # conservative (v7x per-TC)
    if vmem_budget_bytes is None:
        vmem_budget_bytes = min(int(0.72 * vmem_cap), 100 * 2**20)
    if tile_m is None:
        tile_m = 512 if vmem_cap >= 100 * 2**20 else 256

    def est(tm_):
        return _estimate_vmem_bytes(tm_, D, Q, C, xb, cbb, db, ob, rb, emit_res)

    # --- tile selection -----------------------------------------------------------
    # Lane-dense (Q, tm) index output needs tm % 128 == 0 unless the tile covers all
    # tokens; prefer >= 2 tiles so v7x's second TensorCore gets work.
    if M <= 128:
        tm = _round_up(M, 8)                        # single tile covering everything
    else:
        tm = max(128, _round_up(min(int(tile_m), 1 << 20), 128))
        tm = min(tm, _round_up(pl.cdiv(M, 2), 128))  # keep >= 2 grid steps
        while tm > 128 and est(tm) > vmem_budget_bytes:
            tm = max(128, _round_up(tm // 2, 128))

    Mp = _round_up(M, tm)
    num_tiles = Mp // tm
    needs_mask = (Mp != M)

    # --- one-time codebook prep hoisted out of the kernel ---------------------------
    neg2_cb_t = (jnp.swapaxes(codebooks, 1, 2) * (-2)).astype(dist_dtype)   # (Q, D, C)
    cb_f32 = codebooks.astype(jnp.float32)
    cb_sq = jnp.sum(cb_f32 * cb_f32, axis=-1)[:, None, :]                   # (Q, 1, C) f32

    xf = x.reshape(M, D)
    if needs_mask:
        xf = jnp.pad(xf, ((0, Mp - M), (0, 0)))

    kernel = functools.partial(_rvq_kernel, num_quantizers=Q, m_valid=M,
                               needs_mask=needs_mask, emit_residuals=emit_res)

    estimate = est(tm)
    vmem_limit = int(min(int(0.88 * vmem_cap), max(2 * estimate, 48 * 2**20)))
    vmem_limit = max(vmem_limit, 16 * 2**20)

    def _run(single_buffer_constants):
        # Constant-index codebook operands: request a single buffer (no re-DMA
        # happens for unchanged block indices, so a second buffer is pure VMEM cost).
        ckw = {"pipeline_mode": pl.Buffered(1)} if single_buffer_constants else {}
        in_specs = [
            pl.BlockSpec((tm, D), lambda i: (i, 0)),              # token tile
            pl.BlockSpec((Q, C, D), lambda i: (0, 0, 0), **ckw),  # codebooks (gather)
            pl.BlockSpec((Q, D, C), lambda i: (0, 0, 0), **ckw),  # -2 * codebooks^T
            pl.BlockSpec((Q, 1, C), lambda i: (0, 0, 0), **ckw),  # ||codebook||^2
        ]
        out_specs = [
            pl.BlockSpec((tm, D), lambda i: (i, 0)),
            pl.BlockSpec((Q, tm), lambda i: (0, i)),
            pl.BlockSpec((1, 8, 128), lambda i: (i, 0, 0)),
        ]
        out_shapes = [
            jax.ShapeDtypeStruct((Mp, D), out_dtype),                # quantized_out (flat)
            jax.ShapeDtypeStruct((Q, Mp), jnp.int32),                # indices, lane-dense
            jax.ShapeDtypeStruct((num_tiles, 8, 128), jnp.float32),  # per-tile loss sums
        ]
        if emit_res:
            out_specs.append(pl.BlockSpec((Q - 1, tm, D), lambda i: (0, i, 0)))
            out_shapes.append(jax.ShapeDtypeStruct((Q - 1, Mp, D), res_dtype))
        grid_spec = pltpu.PrefetchScalarGridSpec(
            num_scalar_prefetch=0,
            grid=(num_tiles,),
            in_specs=in_specs,
            out_specs=out_specs,
        )
        return pl.pallas_call(
            kernel,
            out_shape=tuple(out_shapes),
            grid_spec=grid_spec,
            compiler_params=pltpu.CompilerParams(
                dimension_semantics=("parallel",),   # token tiles shard across TCs (v7x)
                vmem_limit_bytes=vmem_limit,
            ),
        )(xf, codebooks, neg2_cb_t, cb_sq)

    try:
        outs = _run(True)
        outs = jax.block_until_ready(outs)   # surface compile/exec issues eagerly
    except Exception:
        # Fallback: identical kernel with default (double) buffering everywhere.
        outs = _run(False)

    qout, idx, loss_raw = outs[0], outs[1], outs[2]

    quantized_out = qout[:M].reshape(B, N, D)                   # project_out == Identity
    all_indices = jnp.transpose(idx[:, :M]).reshape(B, N, Q)
    # commitment loss = mean over all (token, dim) elements, per quantizer layer
    all_losses = loss_raw[:, 0, :Q].sum(axis=0) / float(M * D) * commitment_weight

    if not return_residuals:
        all_residuals = None
    elif Q == 1:
        all_residuals = x.astype(res_dtype)[None]               # residual[0] == x exactly
    else:
        res_rest = outs[3][:, :M, :].reshape(Q - 1, B, N, D)
        all_residuals = jnp.concatenate(
            [x.astype(res_dtype)[None], res_rest], axis=0)      # stitch q=0 back in

    return quantized_out, all_indices, all_losses, all_residuals


def _reference(x, codebooks):
    """Pure-JAX reference mirroring the PyTorch forward numerics."""
    B, N, D = x.shape
    Q, C, _ = codebooks.shape
    xf = x.reshape(-1, D).astype(jnp.float32)
    cbs = codebooks.astype(jnp.float32)
    residual = xf
    qout = jnp.zeros_like(xf)
    idxs, resids, losses = [], [], []
    for q in range(Q):
        cb = cbs[q]
        resids.append(residual)
        dist = jnp.sum(cb * cb, -1)[None, :] - 2.0 * residual @ cb.T
        ind = jnp.argmin(dist, -1)
        quant = cb[ind]
        losses.append(jnp.mean((quant - residual) ** 2))
        qout = qout + quant
        residual = residual - quant
        idxs.append(ind)
    return (
        qout.reshape(B, N, D),
        jnp.stack(idxs, -1).reshape(B, N, Q).astype(jnp.int32),
        jnp.stack(losses),
        jnp.stack(resids).reshape(Q, B, N, D),
    )


if __name__ == "__main__":
    key = jax.random.PRNGKey(0)
    kx, kc = jax.random.split(key)

    # Case 1: small shapes consistent with the module (single tile, no padding).
    B, N, D = 2, 8, 32          # batch, seq, dim (== codebook_dim)
    Q, C = 4, 64                # num_quantizers, codebook_size
    x = jax.random.normal(kx, (B, N, D), dtype=jnp.float32)
    codebooks = jax.random.normal(kc, (Q, C, D), dtype=jnp.float32)

    qout, idx, losses, residuals = residual_vq_forward(x, codebooks)
    jax.block_until_ready((qout, idx, losses, residuals))

    r_qout, r_idx, r_losses, r_res = _reference(x, codebooks)
    assert qout.shape == (B, N, D) and idx.shape == (B, N, Q)
    assert losses.shape == (Q,) and residuals.shape == (Q, B, N, D)
    assert jnp.allclose(qout, r_qout, atol=1e-3, rtol=1e-3)
    assert jnp.array_equal(idx, r_idx)
    assert jnp.allclose(losses, r_losses, atol=1e-4, rtol=1e-3)
    assert jnp.allclose(residuals, r_res, atol=1e-3, rtol=1e-3)

    # Case 2: token count not a multiple of the tile -> exercises padding / masking
    # and a multi-tile grid.  Tokens are duplicates of case-1 tokens (row-wise math
    # is independent of tile composition, so results are fully determined).
    B2, N2 = 2, 100
    x2 = jnp.tile(x.reshape(B * N, D), (13, 1))[: B2 * N2].reshape(B2, N2, D)
    qout2, idx2, losses2, residuals2 = residual_vq_forward(x2, codebooks, tile_m=128)
    jax.block_until_ready((qout2, idx2, losses2, residuals2))
    r_qout2, r_idx2, r_losses2, r_res2 = _reference(x2, codebooks)
    assert qout2.shape == (B2, N2, D) and idx2.shape == (B2, N2, Q)
    assert jnp.allclose(qout2, r_qout2, atol=1e-3, rtol=1e-3)
    assert jnp.array_equal(idx2, r_idx2)
    assert jnp.allclose(losses2, r_losses2, atol=1e-4, rtol=1e-3)
    assert jnp.allclose(residuals2, r_res2, atol=1e-3, rtol=1e-3)

    # Case 3: bf16 inputs + codebooks (MXU-native gather path), residuals skipped.
    xb = x.astype(jnp.bfloat16)
    cbb = codebooks.astype(jnp.bfloat16)
    qout3, idx3, losses3, res3 = residual_vq_forward(xb, cbb, return_residuals=False)
    jax.block_until_ready((qout3, idx3, losses3))
    assert res3 is None
    r_qout3, r_idx3, r_losses3, _ = _reference(xb.astype(jnp.float32),
                                               cbb.astype(jnp.float32))
    assert qout3.dtype == jnp.bfloat16 and idx3.shape == (B, N, Q)
    assert jnp.array_equal(idx3, r_idx3)
    assert jnp.allclose(qout3.astype(jnp.float32), r_qout3, atol=3e-2, rtol=3e-2)
    assert jnp.allclose(losses3, r_losses3, atol=1e-2, rtol=2e-2)

    print("KERNEL_OK")
</pallas_src>

<mosaic_0001>
module attributes {stable_mosaic.version = 11 : i64} {
  func.func @_rvq_kernel(%arg0: i32, %arg1: memref<16x32xf32, #tpu.memory_space<vmem>>, %arg2: memref<4x64x32xf32, #tpu.memory_space<vmem>>, %arg3: memref<4x32x64xf32, #tpu.memory_space<vmem>>, %arg4: memref<4x1x64xf32, #tpu.memory_space<vmem>>, %arg5: memref<16x32xf32, #tpu.memory_space<vmem>>, %arg6: memref<4x16xi32, #tpu.memory_space<vmem>>, %arg7: memref<1x8x128xf32, #tpu.memory_space<vmem>>, %arg8: memref<3x16x32xf32, #tpu.memory_space<vmem>>) attributes {dimension_semantics = [#tpu.dimension_semantics<parallel>], iteration_bounds = array<i64: 1>, scalar_prefetch = 0 : i64, scratch_operands = 0 : i64, tpu.core_type = #tpu.core_type<tc>, window_params = [{transform_indices = @transform_0, window_bounds = array<i64: 16, 32>}, {pipeline_mode = #tpu.pipeline_mode<synchronous>, transform_indices = @transform_1, window_bounds = array<i64: 4, 64, 32>}, {pipeline_mode = #tpu.pipeline_mode<synchronous>, transform_indices = @transform_2, window_bounds = array<i64: 4, 32, 64>}, {pipeline_mode = #tpu.pipeline_mode<synchronous>, transform_indices = @transform_3, window_bounds = array<i64: 4, 1, 64>}, {transform_indices = @transform_4, window_bounds = array<i64: 16, 32>}, {transform_indices = @transform_5, window_bounds = array<i64: 4, 16>}, {transform_indices = @transform_6, window_bounds = array<i64: 1, 8, 128>}, {transform_indices = @transform_7, window_bounds = array<i64: 3, 16, 32>}]} {
    %c0 = arith.constant 0 : index
    %c0_0 = arith.constant 0 : index
    %0 = vector.load %arg1[%c0, %c0_0] : memref<16x32xf32, #tpu.memory_space<vmem>>, vector<16x32xf32>
    %cst = arith.constant 0.000000e+00 : f32
    %1 = vector.broadcast %cst : f32 to vector<16x32xf32>
    %2 = tpu.iota {dimensions = array<i32: 1>} : vector<16x64xi32>
    %3 = tpu.iota {dimensions = array<i32: 0>} : vector<8x128xi32>
    %4 = tpu.iota {dimensions = array<i32: 1>} : vector<8x128xi32>
    %cst_1 = arith.constant 0.000000e+00 : f32
    %5 = vector.broadcast %cst_1 : f32 to vector<8x128xf32>
    %c0_2 = arith.constant 0 : index
    %c0_3 = arith.constant 0 : index
    %c0_4 = arith.constant 0 : index
    %6 = vector.load %arg3[%c0_2, %c0_3, %c0_4] : memref<4x32x64xf32, #tpu.memory_space<vmem>>, vector<1x32x64xf32>
    %7 = vector.shape_cast %6 : vector<1x32x64xf32> to vector<32x64xf32>
    %cst_5 = arith.constant dense<0.000000e+00> : vector<16x64xf32>
    %8 = tpu.matmul %0, %7, %cst_5 {dimension_numbers = #tpu.dot_dimension_numbers<[1], [0], [0], [1], [0, 0, 1, 1], [], []>} : vector<16x32xf32>, vector<32x64xf32>, vector<16x64xf32> -> vector<16x64xf32>
    %c0_6 = arith.constant 0 : index
    %c0_7 = arith.constant 0 : index
    %c0_8 = arith.constant 0 : index
    %9 = vector.load %arg4[%c0_6, %c0_7, %c0_8] : memref<4x1x64xf32, #tpu.memory_space<vmem>>, vector<1x1x64xf32>
    %10 = vector.shape_cast %9 : vector<1x1x64xf32> to vector<1x64xf32>
    %11 = vector.broadcast %10 : vector<1x64xf32> to vector<16x64xf32>
    %12 = arith.addf %11, %8 : vector<16x64xf32>
    %13 = tpu.reduce_index %12 {axis = 1 : i32, kind = #tpu.reduction_kind<arg_min>} : vector<16x64xf32> -> vector<16xi32>
    %14 = vector.shape_cast %13 : vector<16xi32> to vector<16x1xi32>
    %15 = vector.broadcast %14 : vector<16x1xi32> to vector<16x64xi32>
    %16 = arith.cmpi eq, %2, %15 : vector<16x64xi32>
    %17 = arith.extui %16 : vector<16x64xi1> to vector<16x64xi32>
    %18 = arith.sitofp %17 : vector<16x64xi32> to vector<16x64xf32>
    %c0_9 = arith.constant 0 : index
    %c0_10 = arith.constant 0 : index
    %c0_11 = arith.constant 0 : index
    %19 = vector.load %arg2[%c0_9, %c0_10, %c0_11] : memref<4x64x32xf32, #tpu.memory_space<vmem>>, vector<1x64x32xf32>
    %20 = vector.shape_cast %19 : vector<1x64x32xf32> to vector<64x32xf32>
    %cst_12 = arith.constant dense<0.000000e+00> : vector<16x32xf32>
    %21 = tpu.matmul %18, %20, %cst_12 {dimension_numbers = #tpu.dot_dimension_numbers<[1], [0], [0], [1], [0, 0, 1, 1], [], []>} : vector<16x64xf32>, vector<64x32xf32>, vector<16x32xf32> -> vector<16x32xf32>
    %22 = arith.subf %21, %0 : vector<16x32xf32>
    %23 = arith.mulf %22, %22 : vector<16x32xf32>
    %24 = vector.shape_cast %23 : vector<16x32xf32> to vector<1x16x32xf32>
    %cst_13 = arith.constant dense<0.000000e+00> : vector<1xf32>
    %25 = vector.multi_reduction <add>, %24, %cst_13 [1, 2] : vector<1x16x32xf32> to vector<1xf32>
    %26 = vector.shape_cast %25 : vector<1xf32> to vector<1x1x1xf32>
    %27 = vector.extract %26[0, 0, 0] : f32 from vector<1x1x1xf32>
    %c0_i32 = arith.constant 0 : i32
    %28 = vector.broadcast %c0_i32 : i32 to vector<8x128xi32>
    %29 = arith.cmpi eq, %3, %28 : vector<8x128xi32>
    %c0_i32_14 = arith.constant 0 : i32
    %30 = vector.broadcast %c0_i32_14 : i32 to vector<8x128xi32>
    %31 = arith.cmpi eq, %4, %30 : vector<8x128xi32>
    %32 = arith.andi %29, %31 : vector<8x128xi1>
    %cst_15 = arith.constant 0.000000e+00 : f32
    %33 = vector.broadcast %27 : f32 to vector<8x128xf32>
    %34 = vector.broadcast %cst_15 : f32 to vector<8x128xf32>
    %35 = arith.select %32, %33, %34 : vector<8x128xi1>, vector<8x128xf32>
    %36 = arith.addf %5, %35 : vector<8x128xf32>
    %37 = arith.addf %1, %21 : vector<16x32xf32>
    %38 = arith.subf %0, %21 : vector<16x32xf32>
    %c0_16 = arith.constant 0 : index
    %c0_17 = arith.constant 0 : index
    %c0_18 = arith.constant 0 : index
    %39 = vector.load %arg8[%c0_16, %c0_17, %c0_18] : memref<3x16x32xf32, #tpu.memory_space<vmem>>, vector<1x16x32xf32>
    %40 = vector.shape_cast %39 : vector<1x16x32xf32> to vector<16x32xf32>
    %41 = vector.shape_cast %38 : vector<16x32xf32> to vector<1x16x32xf32>
    tpu.vector_store %arg8[%c0_16, %c0_17, %c0_18], %41 {strides = array<i32>} : memref<3x16x32xf32, #tpu.memory_space<vmem>>, vector<1x16x32xf32>,
    %c1 = arith.constant 1 : index
    %c0_19 = arith.constant 0 : index
    %c0_20 = arith.constant 0 : index
    %42 = vector.load %arg3[%c1, %c0_19, %c0_20] : memref<4x32x64xf32, #tpu.memory_space<vmem>>, vector<1x32x64xf32>
    %43 = vector.shape_cast %42 : vector<1x32x64xf32> to vector<32x64xf32>
    %cst_21 = arith.constant dense<0.000000e+00> : vector<16x64xf32>
    %44 = tpu.matmul %38, %43, %cst_21 {dimension_numbers = #tpu.dot_dimension_numbers<[1], [0], [0], [1], [0, 0, 1, 1], [], []>} : vector<16x32xf32>, vector<32x64xf32>, vector<16x64xf32> -> vector<16x64xf32>
    %c1_22 = arith.constant 1 : index
    %c0_23 = arith.constant 0 : index
    %c0_24 = arith.constant 0 : index
    %45 = vector.load %arg4[%c1_22, %c0_23, %c0_24] : memref<4x1x64xf32, #tpu.memory_space<vmem>>, vector<1x1x64xf32>
    %46 = vector.shape_cast %45 : vector<1x1x64xf32> to vector<1x64xf32>
    %47 = vector.broadcast %46 : vector<1x64xf32> to vector<16x64xf32>
    %48 = arith.addf %47, %44 : vector<16x64xf32>
    %49 = tpu.reduce_index %48 {axis = 1 : i32, kind = #tpu.reduction_kind<arg_min>} : vector<16x64xf32> -> vector<16xi32>
    %50 = vector.shape_cast %49 : vector<16xi32> to vector<16x1xi32>
    %51 = vector.broadcast %50 : vector<16x1xi32> to vector<16x64xi32>
    %52 = arith.cmpi eq, %2, %51 : vector<16x64xi32>
    %53 = arith.extui %52 : vector<16x64xi1> to vector<16x64xi32>
    %54 = arith.sitofp %53 : vector<16x64xi32> to vector<16x64xf32>
    %c1_25 = arith.constant 1 : index
    %c0_26 = arith.constant 0 : index
    %c0_27 = arith.constant 0 : index
    %55 = vector.load %arg2[%c1_25, %c0_26, %c0_27] : memref<4x64x32xf32, #tpu.memory_space<vmem>>, vector<1x64x32xf32>
    %56 = vector.shape_cast %55 : vector<1x64x32xf32> to vector<64x32xf32>
    %cst_28 = arith.constant dense<0.000000e+00> : vector<16x32xf32>
    %57 = tpu.matmul %54, %56, %cst_28 {dimension_numbers = #tpu.dot_dimension_numbers<[1], [0], [0], [1], [0, 0, 1, 1], [], []>} : vector<16x64xf32>, vector<64x32xf32>, vector<16x32xf32> -> vector<16x32xf32>
    %58 = arith.subf %57, %38 : vector<16x32xf32>
    %59 = arith.mulf %58, %58 : vector<16x32xf32>
    %60 = vector.shape_cast %59 : vector<16x32xf32> to vector<1x16x32xf32>
    %cst_29 = arith.constant dense<0.000000e+00> : vector<1xf32>
    %61 = vector.multi_reduction <add>, %60, %cst_29 [1, 2] : vector<1x16x32xf32> to vector<1xf32>
    %62 = vector.shape_cast %61 : vector<1xf32> to vector<1x1x1xf32>
    %63 = vector.extract %62[0, 0, 0] : f32 from vector<1x1x1xf32>
    %c0_i32_30 = arith.constant 0 : i32
    %64 = vector.broadcast %c0_i32_30 : i32 to vector<8x128xi32>
    %65 = arith.cmpi eq, %3, %64 : vector<8x128xi32>
    %c1_i32 = arith.constant 1 : i32
    %66 = vector.broadcast %c1_i32 : i32 to vector<8x128xi32>
    %67 = arith.cmpi eq, %4, %66 : vector<8x128xi32>
    %68 = arith.andi %65, %67 : vector<8x128xi1>
    %cst_31 = arith.constant 0.000000e+00 : f32
    %69 = vector.broadcast %63 : f32 to vector<8x128xf32>
    %70 = vector.broadcast %cst_31 : f32 to vector<8x128xf32>
    %71 = arith.select %68, %69, %70 : vector<8x128xi1>, vector<8x128xf32>
    %72 = arith.addf %36, %71 : vector<8x128xf32>
    %73 = arith.addf %37, %57 : vector<16x32xf32>
    %74 = arith.subf %38, %57 : vector<16x32xf32>
    %c1_32 = arith.constant 1 : index
    %c0_33 = arith.constant 0 : index
    %c0_34 = arith.constant 0 : index
    %75 = vector.load %arg8[%c1_32, %c0_33, %c0_34] : memref<3x16x32xf32, #tpu.memory_space<vmem>>, vector<1x16x32xf32>
    %76 = vector.shape_cast %75 : vector<1x16x32xf32> to vector<16x32xf32>
    %77 = vector.shape_cast %74 : vector<16x32xf32> to vector<1x16x32xf32>
    tpu.vector_store %arg8[%c1_32, %c0_33, %c0_34], %77 {strides = array<i32>} : memref<3x16x32xf32, #tpu.memory_space<vmem>>, vector<1x16x32xf32>,
    %c2 = arith.constant 2 : index
    %c0_35 = arith.constant 0 : index
    %c0_36 = arith.constant 0 : index
    %78 = vector.load %arg3[%c2, %c0_35, %c0_36] : memref<4x32x64xf32, #tpu.memory_space<vmem>>, vector<1x32x64xf32>
    %79 = vector.shape_cast %78 : vector<1x32x64xf32> to vector<32x64xf32>
    %cst_37 = arith.constant dense<0.000000e+00> : vector<16x64xf32>
    %80 = tpu.matmul %74, %79, %cst_37 {dimension_numbers = #tpu.dot_dimension_numbers<[1], [0], [0], [1], [0, 0, 1, 1], [], []>} : vector<16x32xf32>, vector<32x64xf32>, vector<16x64xf32> -> vector<16x64xf32>
    %c2_38 = arith.constant 2 : index
    %c0_39 = arith.constant 0 : index
    %c0_40 = arith.constant 0 : index
    %81 = vector.load %arg4[%c2_38, %c0_39, %c0_40] : memref<4x1x64xf32, #tpu.memory_space<vmem>>, vector<1x1x64xf32>
    %82 = vector.shape_cast %81 : vector<1x1x64xf32> to vector<1x64xf32>
    %83 = vector.broadcast %82 : vector<1x64xf32> to vector<16x64xf32>
    %84 = arith.addf %83, %80 : vector<16x64xf32>
    %85 = tpu.reduce_index %84 {axis = 1 : i32, kind = #tpu.reduction_kind<arg_min>} : vector<16x64xf32> -> vector<16xi32>
    %86 = vector.shape_cast %85 : vector<16xi32> to vector<16x1xi32>
    %87 = vector.broadcast %86 : vector<16x1xi32> to vector<16x64xi32>
    %88 = arith.cmpi eq, %2, %87 : vector<16x64xi32>
    %89 = arith.extui %88 : vector<16x64xi1> to vector<16x64xi32>
    %90 = arith.sitofp %89 : vector<16x64xi32> to vector<16x64xf32>
    %c2_41 = arith.constant 2 : index
    %c0_42 = arith.constant 0 : index
    %c0_43 = arith.constant 0 : index
    %91 = vector.load %arg2[%c2_41, %c0_42, %c0_43] : memref<4x64x32xf32, #tpu.memory_space<vmem>>, vector<1x64x32xf32>
    %92 = vector.shape_cast %91 : vector<1x64x32xf32> to vector<64x32xf32>
    %cst_44 = arith.constant dense<0.000000e+00> : vector<16x32xf32>
    %93 = tpu.matmul %90, %92, %cst_44 {dimension_numbers = #tpu.dot_dimension_numbers<[1], [0], [0], [1], [0, 0, 1, 1], [], []>} : vector<16x64xf32>, vector<64x32xf32>, vector<16x32xf32> -> vector<16x32xf32>
    %94 = arith.subf %93, %74 : vector<16x32xf32>
    %95 = arith.mulf %94, %94 : vector<16x32xf32>
    %96 = vector.shape_cast %95 : vector<16x32xf32> to vector<1x16x32xf32>
    %cst_45 = arith.constant dense<0.000000e+00> : vector<1xf32>
    %97 = vector.multi_reduction <add>, %96, %cst_45 [1, 2] : vector<1x16x32xf32> to vector<1xf32>
    %98 = vector.shape_cast %97 : vector<1xf32> to vector<1x1x1xf32>
    %99 = vector.extract %98[0, 0, 0] : f32 from vector<1x1x1xf32>
    %c0_i32_46 = arith.constant 0 : i32
    %100 = vector.broadcast %c0_i32_46 : i32 to vector<8x128xi32>
    %101 = arith.cmpi eq, %3, %100 : vector<8x128xi32>
    %c2_i32 = arith.constant 2 : i32
    %102 = vector.broadcast %c2_i32 : i32 to vector<8x128xi32>
    %103 = arith.cmpi eq, %4, %102 : vector<8x128xi32>
    %104 = arith.andi %101, %103 : vector<8x128xi1>
    %cst_47 = arith.constant 0.000000e+00 : f32
    %105 = vector.broadcast %99 : f32 to vector<8x128xf32>
    %106 = vector.broadcast %cst_47 : f32 to vector<8x128xf32>
    %107 = arith.select %104, %105, %106 : vector<8x128xi1>, vector<8x128xf32>
    %108 = arith.addf %72, %107 : vector<8x128xf32>
    %109 = arith.addf %73, %93 : vector<16x32xf32>
    %110 = arith.subf %74, %93 : vector<16x32xf32>
    %c2_48 = arith.constant 2 : index
    %c0_49 = arith.constant 0 : index
    %c0_50 = arith.constant 0 : index
    %111 = vector.load %arg8[%c2_48, %c0_49, %c0_50] : memref<3x16x32xf32, #tpu.memory_space<vmem>>, vector<1x16x32xf32>
    %112 = vector.shape_cast %111 : vector<1x16x32xf32> to vector<16x32xf32>
    %113 = vector.shape_cast %110 : vector<16x32xf32> to vector<1x16x32xf32>
    tpu.vector_store %arg8[%c2_48, %c0_49, %c0_50], %113 {strides = array<i32>} : memref<3x16x32xf32, #tpu.memory_space<vmem>>, vector<1x16x32xf32>,
    %c3 = arith.constant 3 : index
    %c0_51 = arith.constant 0 : index
    %c0_52 = arith.constant 0 : index
    %114 = vector.load %arg3[%c3, %c0_51, %c0_52] : memref<4x32x64xf32, #tpu.memory_space<vmem>>, vector<1x32x64xf32>
    %115 = vector.shape_cast %114 : vector<1x32x64xf32> to vector<32x64xf32>
    %cst_53 = arith.constant dense<0.000000e+00> : vector<16x64xf32>
    %116 = tpu.matmul %110, %115, %cst_53 {dimension_numbers = #tpu.dot_dimension_numbers<[1], [0], [0], [1], [0, 0, 1, 1], [], []>} : vector<16x32xf32>, vector<32x64xf32>, vector<16x64xf32> -> vector<16x64xf32>
    %c3_54 = arith.constant 3 : index
    %c0_55 = arith.constant 0 : index
    %c0_56 = arith.constant 0 : index
    %117 = vector.load %arg4[%c3_54, %c0_55, %c0_56] : memref<4x1x64xf32, #tpu.memory_space<vmem>>, vector<1x1x64xf32>
    %118 = vector.shape_cast %117 : vector<1x1x64xf32> to vector<1x64xf32>
    %119 = vector.broadcast %118 : vector<1x64xf32> to vector<16x64xf32>
    %120 = arith.addf %119, %116 : vector<16x64xf32>
    %121 = tpu.reduce_index %120 {axis = 1 : i32, kind = #tpu.reduction_kind<arg_min>} : vector<16x64xf32> -> vector<16xi32>
    %122 = vector.shape_cast %121 : vector<16xi32> to vector<16x1xi32>
    %123 = vector.broadcast %122 : vector<16x1xi32> to vector<16x64xi32>
    %124 = arith.cmpi eq, %2, %123 : vector<16x64xi32>
    %125 = arith.extui %124 : vector<16x64xi1> to vector<16x64xi32>
    %126 = arith.sitofp %125 : vector<16x64xi32> to vector<16x64xf32>
    %c3_57 = arith.constant 3 : index
    %c0_58 = arith.constant 0 : index
    %c0_59 = arith.constant 0 : index
    %127 = vector.load %arg2[%c3_57, %c0_58, %c0_59] : memref<4x64x32xf32, #tpu.memory_space<vmem>>, vector<1x64x32xf32>
    %128 = vector.shape_cast %127 : vector<1x64x32xf32> to vector<64x32xf32>
    %cst_60 = arith.constant dense<0.000000e+00> : vector<16x32xf32>
    %129 = tpu.matmul %126, %128, %cst_60 {dimension_numbers = #tpu.dot_dimension_numbers<[1], [0], [0], [1], [0, 0, 1, 1], [], []>} : vector<16x64xf32>, vector<64x32xf32>, vector<16x32xf32> -> vector<16x32xf32>
    %130 = arith.subf %129, %110 : vector<16x32xf32>
    %131 = arith.mulf %130, %130 : vector<16x32xf32>
    %132 = vector.shape_cast %131 : vector<16x32xf32> to vector<1x16x32xf32>
    %cst_61 = arith.constant dense<0.000000e+00> : vector<1xf32>
    %133 = vector.multi_reduction <add>, %132, %cst_61 [1, 2] : vector<1x16x32xf32> to vector<1xf32>
    %134 = vector.shape_cast %133 : vector<1xf32> to vector<1x1x1xf32>
    %135 = vector.extract %134[0, 0, 0] : f32 from vector<1x1x1xf32>
    %c0_i32_62 = arith.constant 0 : i32
    %136 = vector.broadcast %c0_i32_62 : i32 to vector<8x128xi32>
    %137 = arith.cmpi eq, %3, %136 : vector<8x128xi32>
    %c3_i32 = arith.constant 3 : i32
    %138 = vector.broadcast %c3_i32 : i32 to vector<8x128xi32>
    %139 = arith.cmpi eq, %4, %138 : vector<8x128xi32>
    %140 = arith.andi %137, %139 : vector<8x128xi1>
    %cst_63 = arith.constant 0.000000e+00 : f32
    %141 = vector.broadcast %135 : f32 to vector<8x128xf32>
    %142 = vector.broadcast %cst_63 : f32 to vector<8x128xf32>
    %143 = arith.select %140, %141, %142 : vector<8x128xi1>, vector<8x128xf32>
    %144 = arith.addf %108, %143 : vector<8x128xf32>
    %145 = arith.addf %109, %129 : vector<16x32xf32>
    %c0_64 = arith.constant 0 : index
    %c0_65 = arith.constant 0 : index
    %146 = vector.load %arg5[%c0_64, %c0_65] : memref<16x32xf32, #tpu.memory_space<vmem>>, vector<16x32xf32>
    tpu.vector_store %arg5[%c0_64, %c0_65], %145 {strides = array<i32>} : memref<16x32xf32, #tpu.memory_space<vmem>>, vector<16x32xf32>,
    %147 = vector.shape_cast %13 : vector<16xi32> to vector<1x16xi32>
    %148 = vector.shape_cast %49 : vector<16xi32> to vector<1x16xi32>
    %149 = vector.shape_cast %85 : vector<16xi32> to vector<1x16xi32>
    %150 = vector.shape_cast %121 : vector<16xi32> to vector<1x16xi32>
    %151 = tpu.concatenate %147, %148, %149, %150 in 0 : vector<1x16xi32>, vector<1x16xi32>, vector<1x16xi32>, vector<1x16xi32> -> vector<4x16xi32>
    %c0_66 = arith.constant 0 : index
    %c0_67 = arith.constant 0 : index
    %152 = vector.load %arg6[%c0_66, %c0_67] : memref<4x16xi32, #tpu.memory_space<vmem>>, vector<4x16xi32>
    tpu.vector_store %arg6[%c0_66, %c0_67], %151 {strides = array<i32>} : memref<4x16xi32, #tpu.memory_space<vmem>>, vector<4x16xi32>,
    %153 = vector.shape_cast %144 : vector<8x128xf32> to vector<1x8x128xf32>
    %c0_68 = arith.constant 0 : index
    %c0_69 = arith.constant 0 : index
    %c0_70 = arith.constant 0 : index
    %154 = vector.load %arg7[%c0_68, %c0_69, %c0_70] : memref<1x8x128xf32, #tpu.memory_space<vmem>>, vector<1x8x128xf32>
    tpu.vector_store %arg7[%c0_68, %c0_69, %c0_70], %153 {strides = array<i32>} : memref<1x8x128xf32, #tpu.memory_space<vmem>>, vector<1x8x128xf32>,
    return
  }
  func.func @transform_0(%arg0: i32) -> (i32, i32) {
    %c0_i32 = arith.constant 0 : i32
    %c0_i32_0 = arith.constant 0 : i32
    return %arg0, %c0_i32 : i32, i32
  }
  func.func @transform_1(%arg0: i32) -> (i32, i32, i32) {
    %c0_i32 = arith.constant 0 : i32
    %c0_i32_0 = arith.constant 0 : i32
    %c0_i32_1 = arith.constant 0 : i32
    %c0_i32_2 = arith.constant 0 : i32
    return %c0_i32, %c0_i32_0, %c0_i32_1 : i32, i32, i32
  }
  func.func @transform_2(%arg0: i32) -> (i32, i32, i32) {
    %c0_i32 = arith.constant 0 : i32
    %c0_i32_0 = arith.constant 0 : i32
    %c0_i32_1 = arith.constant 0 : i32
    %c0_i32_2 = arith.constant 0 : i32
    return %c0_i32, %c0_i32_0, %c0_i32_1 : i32, i32, i32
  }
  func.func @transform_3(%arg0: i32) -> (i32, i32, i32) {
    %c0_i32 = arith.constant 0 : i32
    %c0_i32_0 = arith.constant 0 : i32
    %c0_i32_1 = arith.constant 0 : i32
    %c0_i32_2 = arith.constant 0 : i32
    return %c0_i32, %c0_i32_0, %c0_i32_1 : i32, i32, i32
  }
  func.func @transform_4(%arg0: i32) -> (i32, i32) {
    %c0_i32 = arith.constant 0 : i32
    %c0_i32_0 = arith.constant 0 : i32
    return %arg0, %c0_i32 : i32, i32
  }
  func.func @transform_5(%arg0: i32) -> (i32, i32) {
    %c0_i32 = arith.constant 0 : i32
    %c0_i32_0 = arith.constant 0 : i32
    return %c0_i32, %arg0 : i32, i32
  }
  func.func @transform_6(%arg0: i32) -> (i32, i32, i32) {
    %c0_i32 = arith.constant 0 : i32
    %c0_i32_0 = arith.constant 0 : i32
    %c0_i32_1 = arith.constant 0 : i32
    return %arg0, %c0_i32, %c0_i32_0 : i32, i32, i32
  }
  func.func @transform_7(%arg0: i32) -> (i32, i32, i32) {
    %c0_i32 = arith.constant 0 : i32
    %c0_i32_0 = arith.constant 0 : i32
    %c0_i32_1 = arith.constant 0 : i32
    return %c0_i32, %arg0, %c0_i32_0 : i32, i32, i32
  }
}

module attributes {stable_mosaic.version = 11 : i64} {
  func.func @_rvq_kernel(%arg0: i32, %arg1: memref<16x32xf32, #tpu.memory_space<vmem>>, %arg2: memref<4x64x32xf32, #tpu.memory_space<vmem>>, %arg3: memref<4x32x64xf32, #tpu.memory_space<vmem>>, %arg4: memref<4x1x64xf32, #tpu.memory_space<vmem>>, %arg5: memref<16x32xf32, #tpu.memory_space<vmem>>, %arg6: memref<4x16xi32, #tpu.memory_space<vmem>>, %arg7: memref<1x8x128xf32, #tpu.memory_space<vmem>>, %arg8: memref<3x16x32xf32, #tpu.memory_space<vmem>>) attributes {dimension_semantics = [#tpu.dimension_semantics<parallel>], iteration_bounds = array<i64: 1>, scalar_prefetch = 0 : i64, scratch_operands = 0 : i64, tpu.core_type = #tpu.core_type<tc>, window_params = [{transform_indices = @transform_0, window_bounds = array<i64: 16, 32>}, {pipeline_mode = #tpu.pipeline_mode<synchronous>, transform_indices = @transform_1, window_bounds = array<i64: 4, 64, 32>}, {pipeline_mode = #tpu.pipeline_mode<synchronous>, transform_indices = @transform_2, window_bounds = array<i64: 4, 32, 64>}, {pipeline_mode = #tpu.pipeline_mode<synchronous>, transform_indices = @transform_3, window_bounds = array<i64: 4, 1, 64>}, {transform_indices = @transform_4, window_bounds = array<i64: 16, 32>}, {transform_indices = @transform_5, window_bounds = array<i64: 4, 16>}, {transform_indices = @transform_6, window_bounds = array<i64: 1, 8, 128>}, {transform_indices = @transform_7, window_bounds = array<i64: 3, 16, 32>}]} {
    %c0 = arith.constant 0 : index
    %c0_0 = arith.constant 0 : index
    %0 = vector.load %arg1[%c0, %c0_0] : memref<16x32xf32, #tpu.memory_space<vmem>>, vector<16x32xf32>
    %cst = arith.constant 0.000000e+00 : f32
    %1 = vector.broadcast %cst : f32 to vector<16x32xf32>
    %2 = tpu.iota {dimensions = array<i32: 1>} : vector<16x64xi32>
    %3 = tpu.iota {dimensions = array<i32: 0>} : vector<8x128xi32>
    %4 = tpu.iota {dimensions = array<i32: 1>} : vector<8x128xi32>
    %cst_1 = arith.constant 0.000000e+00 : f32
    %5 = vector.broadcast %cst_1 : f32 to vector<8x128xf32>
    %c0_2 = arith.constant 0 : index
    %c0_3 = arith.constant 0 : index
    %c0_4 = arith.constant 0 : index
    %6 = vector.load %arg3[%c0_2, %c0_3, %c0_4] : memref<4x32x64xf32, #tpu.memory_space<vmem>>, vector<1x32x64xf32>
    %7 = vector.shape_cast %6 : vector<1x32x64xf32> to vector<32x64xf32>
    %cst_5 = arith.constant dense<0.000000e+00> : vector<16x64xf32>
    %8 = tpu.matmul %0, %7, %cst_5 {dimension_numbers = #tpu.dot_dimension_numbers<[1], [0], [0], [1], [0, 0, 1, 1], [], []>} : vector<16x32xf32>, vector<32x64xf32>, vector<16x64xf32> -> vector<16x64xf32>
    %c0_6 = arith.constant 0 : index
    %c0_7 = arith.constant 0 : index
    %c0_8 = arith.constant 0 : index
    %9 = vector.load %arg4[%c0_6, %c0_7, %c0_8] : memref<4x1x64xf32, #tpu.memory_space<vmem>>, vector<1x1x64xf32>
    %10 = vector.shape_cast %9 : vector<1x1x64xf32> to vector<1x64xf32>
    %11 = vector.broadcast %10 : vector<1x64xf32> to vector<16x64xf32>
    %12 = arith.addf %11, %8 : vector<16x64xf32>
    %13 = tpu.reduce_index %12 {axis = 1 : i32, kind = #tpu.reduction_kind<arg_min>} : vector<16x64xf32> -> vector<16xi32>
    %14 = vector.shape_cast %13 : vector<16xi32> to vector<16x1xi32>
    %15 = vector.broadcast %14 : vector<16x1xi32> to vector<16x64xi32>
    %16 = arith.cmpi eq, %2, %15 : vector<16x64xi32>
    %17 = arith.extui %16 : vector<16x64xi1> to vector<16x64xi32>
    %18 = arith.sitofp %17 : vector<16x64xi32> to vector<16x64xf32>
    %c0_9 = arith.constant 0 : index
    %c0_10 = arith.constant 0 : index
    %c0_11 = arith.constant 0 : index
    %19 = vector.load %arg2[%c0_9, %c0_10, %c0_11] : memref<4x64x32xf32, #tpu.memory_space<vmem>>, vector<1x64x32xf32>
    %20 = vector.shape_cast %19 : vector<1x64x32xf32> to vector<64x32xf32>
    %cst_12 = arith.constant dense<0.000000e+00> : vector<16x32xf32>
    %21 = tpu.matmul %18, %20, %cst_12 {dimension_numbers = #tpu.dot_dimension_numbers<[1], [0], [0], [1], [0, 0, 1, 1], [], []>} : vector<16x64xf32>, vector<64x32xf32>, vector<16x32xf32> -> vector<16x32xf32>
    %22 = arith.subf %21, %0 : vector<16x32xf32>
    %23 = arith.mulf %22, %22 : vector<16x32xf32>
    %24 = vector.shape_cast %23 : vector<16x32xf32> to vector<1x16x32xf32>
    %cst_13 = arith.constant dense<0.000000e+00> : vector<1xf32>
    %25 = vector.multi_reduction <add>, %24, %cst_13 [1, 2] : vector<1x16x32xf32> to vector<1xf32>
    %26 = vector.shape_cast %25 : vector<1xf32> to vector<1x1x1xf32>
    %27 = vector.extract %26[0, 0, 0] : f32 from vector<1x1x1xf32>
    %c0_i32 = arith.constant 0 : i32
    %28 = vector.broadcast %c0_i32 : i32 to vector<8x128xi32>
    %29 = arith.cmpi eq, %3, %28 : vector<8x128xi32>
    %c0_i32_14 = arith.constant 0 : i32
    %30 = vector.broadcast %c0_i32_14 : i32 to vector<8x128xi32>
    %31 = arith.cmpi eq, %4, %30 : vector<8x128xi32>
    %32 = arith.andi %29, %31 : vector<8x128xi1>
    %cst_15 = arith.constant 0.000000e+00 : f32
    %33 = vector.broadcast %27 : f32 to vector<8x128xf32>
    %34 = vector.broadcast %cst_15 : f32 to vector<8x128xf32>
    %35 = arith.select %32, %33, %34 : vector<8x128xi1>, vector<8x128xf32>
    %36 = arith.addf %5, %35 : vector<8x128xf32>
    %37 = arith.addf %1, %21 : vector<16x32xf32>
    %38 = arith.subf %0, %21 : vector<16x32xf32>
    %c0_16 = arith.constant 0 : index
    %c0_17 = arith.constant 0 : index
    %c0_18 = arith.constant 0 : index
    %39 = vector.load %arg8[%c0_16, %c0_17, %c0_18] : memref<3x16x32xf32, #tpu.memory_space<vmem>>, vector<1x16x32xf32>
    %40 = vector.shape_cast %39 : vector<1x16x32xf32> to vector<16x32xf32>
    %41 = vector.shape_cast %38 : vector<16x32xf32> to vector<1x16x32xf32>
    tpu.vector_store %arg8[%c0_16, %c0_17, %c0_18], %41 {strides = array<i32>} : memref<3x16x32xf32, #tpu.memory_space<vmem>>, vector<1x16x32xf32>,
    %c1 = arith.constant 1 : index
    %c0_19 = arith.constant 0 : index
    %c0_20 = arith.constant 0 : index
    %42 = vector.load %arg3[%c1, %c0_19, %c0_20] : memref<4x32x64xf32, #tpu.memory_space<vmem>>, vector<1x32x64xf32>
    %43 = vector.shape_cast %42 : vector<1x32x64xf32> to vector<32x64xf32>
    %cst_21 = arith.constant dense<0.000000e+00> : vector<16x64xf32>
    %44 = tpu.matmul %38, %43, %cst_21 {dimension_numbers = #tpu.dot_dimension_numbers<[1], [0], [0], [1], [0, 0, 1, 1], [], []>} : vector<16x32xf32>, vector<32x64xf32>, vector<16x64xf32> -> vector<16x64xf32>
    %c1_22 = arith.constant 1 : index
    %c0_23 = arith.constant 0 : index
    %c0_24 = arith.constant 0 : index
    %45 = vector.load %arg4[%c1_22, %c0_23, %c0_24] : memref<4x1x64xf32, #tpu.memory_space<vmem>>, vector<1x1x64xf32>
    %46 = vector.shape_cast %45 : vector<1x1x64xf32> to vector<1x64xf32>
    %47 = vector.broadcast %46 : vector<1x64xf32> to vector<16x64xf32>
    %48 = arith.addf %47, %44 : vector<16x64xf32>
    %49 = tpu.reduce_index %48 {axis = 1 : i32, kind = #tpu.reduction_kind<arg_min>} : vector<16x64xf32> -> vector<16xi32>
    %50 = vector.shape_cast %49 : vector<16xi32> to vector<16x1xi32>
    %51 = vector.broadcast %50 : vector<16x1xi32> to vector<16x64xi32>
    %52 = arith.cmpi eq, %2, %51 : vector<16x64xi32>
    %53 = arith.extui %52 : vector<16x64xi1> to vector<16x64xi32>
    %54 = arith.sitofp %53 : vector<16x64xi32> to vector<16x64xf32>
    %c1_25 = arith.constant 1 : index
    %c0_26 = arith.constant 0 : index
    %c0_27 = arith.constant 0 : index
    %55 = vector.load %arg2[%c1_25, %c0_26, %c0_27] : memref<4x64x32xf32, #tpu.memory_space<vmem>>, vector<1x64x32xf32>
    %56 = vector.shape_cast %55 : vector<1x64x32xf32> to vector<64x32xf32>
    %cst_28 = arith.constant dense<0.000000e+00> : vector<16x32xf32>
    %57 = tpu.matmul %54, %56, %cst_28 {dimension_numbers = #tpu.dot_dimension_numbers<[1], [0], [0], [1], [0, 0, 1, 1], [], []>} : vector<16x64xf32>, vector<64x32xf32>, vector<16x32xf32> -> vector<16x32xf32>
    %58 = arith.subf %57, %38 : vector<16x32xf32>
    %59 = arith.mulf %58, %58 : vector<16x32xf32>
    %60 = vector.shape_cast %59 : vector<16x32xf32> to vector<1x16x32xf32>
    %cst_29 = arith.constant dense<0.000000e+00> : vector<1xf32>
    %61 = vector.multi_reduction <add>, %60, %cst_29 [1, 2] : vector<1x16x32xf32> to vector<1xf32>
    %62 = vector.shape_cast %61 : vector<1xf32> to vector<1x1x1xf32>
    %63 = vector.extract %62[0, 0, 0] : f32 from vector<1x1x1xf32>
    %c0_i32_30 = arith.constant 0 : i32
    %64 = vector.broadcast %c0_i32_30 : i32 to vector<8x128xi32>
    %65 = arith.cmpi eq, %3, %64 : vector<8x128xi32>
    %c1_i32 = arith.constant 1 : i32
    %66 = vector.broadcast %c1_i32 : i32 to vector<8x128xi32>
    %67 = arith.cmpi eq, %4, %66 : vector<8x128xi32>
    %68 = arith.andi %65, %67 : vector<8x128xi1>
    %cst_31 = arith.constant 0.000000e+00 : f32
    %69 = vector.broadcast %63 : f32 to vector<8x128xf32>
    %70 = vector.broadcast %cst_31 : f32 to vector<8x128xf32>
    %71 = arith.select %68, %69, %70 : vector<8x128xi1>, vector<8x128xf32>
    %72 = arith.addf %36, %71 : vector<8x128xf32>
    %73 = arith.addf %37, %57 : vector<16x32xf32>
    %74 = arith.subf %38, %57 : vector<16x32xf32>
    %c1_32 = arith.constant 1 : index
    %c0_33 = arith.constant 0 : index
    %c0_34 = arith.constant 0 : index
    %75 = vector.load %arg8[%c1_32, %c0_33, %c0_34] : memref<3x16x32xf32, #tpu.memory_space<vmem>>, vector<1x16x32xf32>
    %76 = vector.shape_cast %75 : vector<1x16x32xf32> to vector<16x32xf32>
    %77 = vector.shape_cast %74 : vector<16x32xf32> to vector<1x16x32xf32>
    tpu.vector_store %arg8[%c1_32, %c0_33, %c0_34], %77 {strides = array<i32>} : memref<3x16x32xf32, #tpu.memory_space<vmem>>, vector<1x16x32xf32>,
    %c2 = arith.constant 2 : index
    %c0_35 = arith.constant 0 : index
    %c0_36 = arith.constant 0 : index
    %78 = vector.load %arg3[%c2, %c0_35, %c0_36] : memref<4x32x64xf32, #tpu.memory_space<vmem>>, vector<1x32x64xf32>
    %79 = vector.shape_cast %78 : vector<1x32x64xf32> to vector<32x64xf32>
    %cst_37 = arith.constant dense<0.000000e+00> : vector<16x64xf32>
    %80 = tpu.matmul %74, %79, %cst_37 {dimension_numbers = #tpu.dot_dimension_numbers<[1], [0], [0], [1], [0, 0, 1, 1], [], []>} : vector<16x32xf32>, vector<32x64xf32>, vector<16x64xf32> -> vector<16x64xf32>
    %c2_38 = arith.constant 2 : index
    %c0_39 = arith.constant 0 : index
    %c0_40 = arith.constant 0 : index
    %81 = vector.load %arg4[%c2_38, %c0_39, %c0_40] : memref<4x1x64xf32, #tpu.memory_space<vmem>>, vector<1x1x64xf32>
    %82 = vector.shape_cast %81 : vector<1x1x64xf32> to vector<1x64xf32>
    %83 = vector.broadcast %82 : vector<1x64xf32> to vector<16x64xf32>
    %84 = arith.addf %83, %80 : vector<16x64xf32>
    %85 = tpu.reduce_index %84 {axis = 1 : i32, kind = #tpu.reduction_kind<arg_min>} : vector<16x64xf32> -> vector<16xi32>
    %86 = vector.shape_cast %85 : vector<16xi32> to vector<16x1xi32>
    %87 = vector.broadcast %86 : vector<16x1xi32> to vector<16x64xi32>
    %88 = arith.cmpi eq, %2, %87 : vector<16x64xi32>
    %89 = arith.extui %88 : vector<16x64xi1> to vector<16x64xi32>
    %90 = arith.sitofp %89 : vector<16x64xi32> to vector<16x64xf32>
    %c2_41 = arith.constant 2 : index
    %c0_42 = arith.constant 0 : index
    %c0_43 = arith.constant 0 : index
    %91 = vector.load %arg2[%c2_41, %c0_42, %c0_43] : memref<4x64x32xf32, #tpu.memory_space<vmem>>, vector<1x64x32xf32>
    %92 = vector.shape_cast %91 : vector<1x64x32xf32> to vector<64x32xf32>
    %cst_44 = arith.constant dense<0.000000e+00> : vector<16x32xf32>
    %93 = tpu.matmul %90, %92, %cst_44 {dimension_numbers = #tpu.dot_dimension_numbers<[1], [0], [0], [1], [0, 0, 1, 1], [], []>} : vector<16x64xf32>, vector<64x32xf32>, vector<16x32xf32> -> vector<16x32xf32>
    %94 = arith.subf %93, %74 : vector<16x32xf32>
    %95 = arith.mulf %94, %94 : vector<16x32xf32>
    %96 = vector.shape_cast %95 : vector<16x32xf32> to vector<1x16x32xf32>
    %cst_45 = arith.constant dense<0.000000e+00> : vector<1xf32>
    %97 = vector.multi_reduction <add>, %96, %cst_45 [1, 2] : vector<1x16x32xf32> to vector<1xf32>
    %98 = vector.shape_cast %97 : vector<1xf32> to vector<1x1x1xf32>
    %99 = vector.extract %98[0, 0, 0] : f32 from vector<1x1x1xf32>
    %c0_i32_46 = arith.constant 0 : i32
    %100 = vector.broadcast %c0_i32_46 : i32 to vector<8x128xi32>
    %101 = arith.cmpi eq, %3, %100 : vector<8x128xi32>
    %c2_i32 = arith.constant 2 : i32
    %102 = vector.broadcast %c2_i32 : i32 to vector<8x128xi32>
    %103 = arith.cmpi eq, %4, %102 : vector<8x128xi32>
    %104 = arith.andi %101, %103 : vector<8x128xi1>
    %cst_47 = arith.constant 0.000000e+00 : f32
    %105 = vector.broadcast %99 : f32 to vector<8x128xf32>
    %106 = vector.broadcast %cst_47 : f32 to vector<8x128xf32>
    %107 = arith.select %104, %105, %106 : vector<8x128xi1>, vector<8x128xf32>
    %108 = arith.addf %72, %107 : vector<8x128xf32>
    %109 = arith.addf %73, %93 : vector<16x32xf32>
    %110 = arith.subf %74, %93 : vector<16x32xf32>
    %c2_48 = arith.constant 2 : index
    %c0_49 = arith.constant 0 : index
    %c0_50 = arith.constant 0 : index
    %111 = vector.load %arg8[%c2_48, %c0_49, %c0_50] : memref<3x16x32xf32, #tpu.memory_space<vmem>>, vector<1x16x32xf32>
    %112 = vector.shape_cast %111 : vector<1x16x32xf32> to vector<16x32xf32>
    %113 = vector.shape_cast %110 : vector<16x32xf32> to vector<1x16x32xf32>
    tpu.vector_store %arg8[%c2_48, %c0_49, %c0_50], %113 {strides = array<i32>} : memref<3x16x32xf32, #tpu.memory_space<vmem>>, vector<1x16x32xf32>,
    %c3 = arith.constant 3 : index
    %c0_51 = arith.constant 0 : index
    %c0_52 = arith.constant 0 : index
    %114 = vector.load %arg3[%c3, %c0_51, %c0_52] : memref<4x32x64xf32, #tpu.memory_space<vmem>>, vector<1x32x64xf32>
    %115 = vector.shape_cast %114 : vector<1x32x64xf32> to vector<32x64xf32>
    %cst_53 = arith.constant dense<0.000000e+00> : vector<16x64xf32>
    %116 = tpu.matmul %110, %115, %cst_53 {dimension_numbers = #tpu.dot_dimension_numbers<[1], [0], [0], [1], [0, 0, 1, 1], [], []>} : vector<16x32xf32>, vector<32x64xf32>, vector<16x64xf32> -> vector<16x64xf32>
    %c3_54 = arith.constant 3 : index
    %c0_55 = arith.constant 0 : index
    %c0_56 = arith.constant 0 : index
    %117 = vector.load %arg4[%c3_54, %c0_55, %c0_56] : memref<4x1x64xf32, #tpu.memory_space<vmem>>, vector<1x1x64xf32>
    %118 = vector.shape_cast %117 : vector<1x1x64xf32> to vector<1x64xf32>
    %119 = vector.broadcast %118 : vector<1x64xf32> to vector<16x64xf32>
    %120 = arith.addf %119, %116 : vector<16x64xf32>
    %121 = tpu.reduce_index %120 {axis = 1 : i32, kind = #tpu.reduction_kind<arg_min>} : vector<16x64xf32> -> vector<16xi32>
    %122 = vector.shape_cast %121 : vector<16xi32> to vector<16x1xi32>
    %123 = vector.broadcast %122 : vector<16x1xi32> to vector<16x64xi32>
    %124 = arith.cmpi eq, %2, %123 : vector<16x64xi32>
    %125 = arith.extui %124 : vector<16x64xi1> to vector<16x64xi32>
    %126 = arith.sitofp %125 : vector<16x64xi32> to vector<16x64xf32>
    %c3_57 = arith.constant 3 : index
    %c0_58 = arith.constant 0 : index
    %c0_59 = arith.constant 0 : index
    %127 = vector.load %arg2[%c3_57, %c0_58, %c0_59] : memref<4x64x32xf32, #tpu.memory_space<vmem>>, vector<1x64x32xf32>
    %128 = vector.shape_cast %127 : vector<1x64x32xf32> to vector<64x32xf32>
    %cst_60 = arith.constant dense<0.000000e+00> : vector<16x32xf32>
    %129 = tpu.matmul %126, %128, %cst_60 {dimension_numbers = #tpu.dot_dimension_numbers<[1], [0], [0], [1], [0, 0, 1, 1], [], []>} : vector<16x64xf32>, vector<64x32xf32>, vector<16x32xf32> -> vector<16x32xf32>
    %130 = arith.subf %129, %110 : vector<16x32xf32>
    %131 = arith.mulf %130, %130 : vector<16x32xf32>
    %132 = vector.shape_cast %131 : vector<16x32xf32> to vector<1x16x32xf32>
    %cst_61 = arith.constant dense<0.000000e+00> : vector<1xf32>
    %133 = vector.multi_reduction <add>, %132, %cst_61 [1, 2] : vector<1x16x32xf32> to vector<1xf32>
    %134 = vector.shape_cast %133 : vector<1xf32> to vector<1x1x1xf32>
    %135 = vector.extract %134[0, 0, 0] : f32 from vector<1x1x1xf32>
    %c0_i32_62 = arith.constant 0 : i32
    %136 = vector.broadcast %c0_i32_62 : i32 to vector<8x128xi32>
    %137 = arith.cmpi eq, %3, %136 : vector<8x128xi32>
    %c3_i32 = arith.constant 3 : i32
    %138 = vector.broadcast %c3_i32 : i32 to vector<8x128xi32>
    %139 = arith.cmpi eq, %4, %138 : vector<8x128xi32>
    %140 = arith.andi %137, %139 : vector<8x128xi1>
    %cst_63 = arith.constant 0.000000e+00 : f32
    %141 = vector.broadcast %135 : f32 to vector<8x128xf32>
    %142 = vector.broadcast %cst_63 : f32 to vector<8x128xf32>
    %143 = arith.select %140, %141, %142 : vector<8x128xi1>, vector<8x128xf32>
    %144 = arith.addf %108, %143 : vector<8x128xf32>
    %145 = arith.addf %109, %129 : vector<16x32xf32>
    %c0_64 = arith.constant 0 : index
    %c0_65 = arith.constant 0 : index
    %146 = vector.load %arg5[%c0_64, %c0_65] : memref<16x32xf32, #tpu.memory_space<vmem>>, vector<16x32xf32>
    tpu.vector_store %arg5[%c0_64, %c0_65], %145 {strides = array<i32>} : memref<16x32xf32, #tpu.memory_space<vmem>>, vector<16x32xf32>,
    %147 = vector.shape_cast %13 : vector<16xi32> to vector<1x16xi32>
    %148 = vector.shape_cast %49 : vector<16xi32> to vector<1x16xi32>
    %149 = vector.shape_cast %85 : vector<16xi32> to vector<1x16xi32>
    %150 = vector.shape_cast %121 : vector<16xi32> to vector<1x16xi32>
    %151 = tpu.concatenate %147, %148, %149, %150 in 0 : vector<1x16xi32>, vector<1x16xi32>, vector<1x16xi32>, vector<1x16xi32> -> vector<4x16xi32>
    %c0_66 = arith.constant 0 : index
    %c0_67 = arith.constant 0 : index
    %152 = vector.load %arg6[%c0_66, %c0_67] : memref<4x16xi32, #tpu.memory_space<vmem>>, vector<4x16xi32>
    tpu.vector_store %arg6[%c0_66, %c0_67], %151 {strides = array<i32>} : memref<4x16xi32, #tpu.memory_space<vmem>>, vector<4x16xi32>,
    %153 = vector.shape_cast %144 : vector<8x128xf32> to vector<1x8x128xf32>
    %c0_68 = arith.constant 0 : index
    %c0_69 = arith.constant 0 : index
    %c0_70 = arith.constant 0 : index
    %154 = vector.load %arg7[%c0_68, %c0_69, %c0_70] : memref<1x8x128xf32, #tpu.memory_space<vmem>>, vector<1x8x128xf32>
    tpu.vector_store %arg7[%c0_68, %c0_69, %c0_70], %153 {strides = array<i32>} : memref<1x8x128xf32, #tpu.memory_space<vmem>>, vector<1x8x128xf32>,
    return
  }
  func.func @transform_0(%arg0: i32) -> (i32, i32) {
    %c0_i32 = arith.constant 0 : i32
    %c0_i32_0 = arith.constant 0 : i32
    return %arg0, %c0_i32 : i32, i32
  }
  func.func @transform_1(%arg0: i32) -> (i32, i32, i32) {
    %c0_i32 = arith.constant 0 : i32
    %c0_i32_0 = arith.constant 0 : i32
    %c0_i32_1 = arith.constant 0 : i32
    %c0_i32_2 = arith.constant 0 : i32
    return %c0_i32, %c0_i32_0, %c0_i32_1 : i32, i32, i32
  }
  func.func @transform_2(%arg0: i32) -> (i32, i32, i32) {
    %c0_i32 = arith.constant 0 : i32
    %c0_i32_0 = arith.constant 0 : i32
    %c0_i32_1 = arith.constant 0 : i32
    %c0_i32_2 = arith.constant 0 : i32
    return %c0_i32, %c0_i32_0, %c0_i32_1 : i32, i32, i32
  }
  func.func @transform_3(%arg0: i32) -> (i32, i32, i32) {
    %c0_i32 = arith.constant 0 : i32
    %c0_i32_0 = arith.constant 0 : i32
    %c0_i32_1 = arith.constant 0 : i32
    %c0_i32_2 = arith.constant 0 : i32
    return %c0_i32, %c0_i32_0, %c0_i32_1 : i32, i32, i32
  }
  func.func @transform_4(%arg0: i32) -> (i32, i32) {
    %c0_i32 = arith.constant 0 : i32
    %c0_i32_0 = arith.constant 0 : i32
    return %arg0, %c0_i32 : i32, i32
  }
  func.func @transform_5(%arg0: i32) -> (i32, i32) {
    %c0_i32 = arith.constant 0 : i32
    %c0_i32_0 = arith.constant 0 : i32
    return %c0_i32, %arg0 : i32, i32
  }
  func.func @transform_6(%arg0: i32) -> (i32, i32, i32) {
    %c0_i32 = arith.constant 0 : i32
    %c0_i32_0 = arith.constant 0 : i32
    %c0_i32_1 = arith.constant 0 : i32
    return %arg0, %c0_i32, %c0_i32_0 : i32, i32, i32
  }
  func.func @transform_7(%arg0: i32) -> (i32, i32, i32) {
    %c0_i32 = arith.constant 0 : i32
    %c0_i32_0 = arith.constant 0 : i32
    %c0_i32_1 = arith.constant 0 : i32
    return %c0_i32, %arg0, %c0_i32_0 : i32, i32, i32
  }
}

</mosaic_0001>

<bundles_post_ra>
// kernel: tpu_custom_call.1
= control target key start
LH: loop header
LB: loop body
LE: loop exit
PB: predicated region body
PF: predicated region fallthrough
CT: control target
= control target key end

     0   :  { %13 = vsyncpa [#allocation3], 0  ;;  %s1795_s0 = inlined_call_operand.vmem [shape: f32[16,32], index: 0, kind: input, shape index: {}]   ;;  %s1796_s1 = inlined_call_operand.vmem [shape: f32[4,64,32], index: 1, kind: input, shape index: {}]   ;;  %s1797_s2 = inlined_call_operand.vmem [shape: f32[4,32,64], index: 2, kind: input, shape index: {}]   ;;  %s1798_s3 = inlined_call_operand.vmem [shape: f32[4,1,64], index: 3, kind: input, shape index: {}]   ;;  %s1799_s4 = inlined_call_operand.hbm [shape: f32[16,32], index: 4, kind: output, shape index: {0}]   ;;  %s1800_s5 = inlined_call_operand.hbm [shape: s32[4,16], index: 5, kind: output, shape index: {1}]   ;;  %s1801_s6 = inlined_call_operand.hbm [shape: f32[1,8,128], index: 6, kind: output, shape index: {2}]   ;;  %s1802_s7 = inlined_call_operand.hbm [shape: f32[3,16,32], index: 7, kind: output, shape index: {3}]  }
   0x1   :  { %14 = vsyncpa [#allocation5], 0  ;;  %v33_v0 = vld [vmem:[%s1797_s2 + $0x18] sm:$0xff]  ;;  %v32_v1 = vld [vmem:[%s1797_s2 + $0x10] sm:$0xff]  ;;  %vm34_vm0 = vcmask 261120  }
   0x2   :  { %1167 = vmatprep.subr.mxu1 %v33_v0  ;;  %v1444_v2 = vld [vmem:[%s1795_s0] sm:$0xff]  ;;  %v31_v3 = vld [vmem:[%s1797_s2 + $0x8] sm:$0xff] }
   0x3   :  { %1168 = vmatpush3.msra.mxu1 %v33_v0  ;;  %1175 = vmatprep.mubr.msk.f32.mxu1 %vm34_vm0, %v1444_v2 }
   0x4   :  { %15 = vsyncpa [#allocation8], 0  ;;  %1169 = vmatprep.subr.mxu1 %v32_v1  ;;  %v30_v4 = vld [vmem:[%s1797_s2] sm:$0xff]  ;;  %v1457_v5 = vld [vmem:[%s1795_s0 + $0x8] sm:$0xff]  ;;  %vm125_vm1 = vcmask 523264   ;;  %v26_v22 = vlaneseq  ;;  %v1388_v25 = vmov 0.0  }
   0x5   :  { %1170 = vmatpush3.msra.mxu1 %v32_v1  ;;  %v145_v6 = vld [vmem:[%s1796_s1 + $0x38] sm:$0xff]  ;;  %v144_v7 = vld [vmem:[%s1796_s1 + $0x30] sm:$0xff]  ;;  %v143_v8 = vld [vmem:[%s1796_s1 + $0x28] sm:$0xff]  ;;  %vm939_vm5 = vcmask 130112   ;;  %vm968_vm7 = vcmask 1040384   ;;  %vm970_vm11 = vcmask 1041408  }
   0x6   :  { %1171 = vmatprep.subr.mxu1 %v31_v3  ;;  %v142_v9 = vld [vmem:[%s1796_s1 + $0x20] sm:$0xff]  ;;  %v141_v10 = vld [vmem:[%s1796_s1 + $0x18] sm:$0xff]  ;;  %v140_v18 = vld [vmem:[%s1796_s1 + $0x10] sm:$0xff]  ;;  %v1494_v23 = vand.u32 127, %v26_v22  ;;  %v1571_v53 = vshrl.u32 %v26_v22, 7  ;;  %vm972_vm13 = vcmask 1042432  }
   0x7   :  { %1172 = vmatpush3.msra.mxu1 %v31_v3  ;;  %v1038_v12 = vld [vmem:[%s1798_s3] ss:$0 sm:$0xff]  ;;  %v139_v19 = vld [vmem:[%s1796_s1 + $0x8] sm:$0xff]  ;;  %v1046_v21 = vld [vmem:[%s1797_s2 + $0x38] sm:$0xff]  ;;  %vm974_vm14 = vcmask 125952   ;;  %s1390_s12 = smov [#allocation2]  }
   0x8   :  { %1173 = vmatprep.subr.mxu1 %v30_v4  ;;  %v138_v20 = vld [vmem:[%s1796_s1] sm:$0xff]  ;;  %1197 = vmatprep.subr.mxu0 %v1046_v21  ;;  %v1045_v29 = vld [vmem:[%s1797_s2 + $0x30] sm:$0xff]  ;;  %v1044_v30 = vld [vmem:[%s1797_s2 + $0x28] sm:$0xff]  ;;  %v934_v52 = vadd.s32 4294967288, %v1494_v23  ;;  %v1578_v55 = vsub.s32 %v1494_v23, %v1571_v53  ;;  %s982_s13 = sshll.u32 %s1390_s12, 4  ;;  %s983_s13 = int_to_ptr.vmem [resolvable:$true] %s982_s13 }
   0x9   :  { %1174 = vmatpush3.msra.mxu1 %v30_v4  ;;  %1198 = vmatpush3.msra.mxu0 %v1046_v21  ;;  %v1043_v31 = vld [vmem:[%s1797_s2 + $0x20] sm:$0xff]  ;;  %v1060_v36 = vld [vmem:[%s1796_s1 + $0x78] sm:$0xff]  ;;  %v1059_v37 = vld [vmem:[%s1796_s1 + $0x70] sm:$0xff] }
   0xa   :  { %1176 = vmatmul.mubr.msk.f32.vlgmr.msra.gmra.mxu1 %vm34_vm0, %v1457_v5  ;;  %1178 = vmatprep.subr.mxu1 %v145_v6  ;;  %v1058_v38 = vld [vmem:[%s1796_s1 + $0x68] sm:$0xff]  ;;  %v1057_v39 = vld [vmem:[%s1796_s1 + $0x60] sm:$0xff]  ;;  %v1056_v40 = vld [vmem:[%s1796_s1 + $0x58] sm:$0xff]  ;;  %v1574_v54 = vsub.s32 %v934_v52, %v1571_v53 }
   0xb   :  { %1179 = vmatpush3.msra.mxu1 %v145_v6  ;;  %1199 = vmatprep.subr.mxu0 %v1045_v29  ;;  %v1050_v42 = vld [vmem:[%s1798_s3 + $0x1] ss:$0 sm:$0xff]  ;;  %v1055_v48 = vld [vmem:[%s1796_s1 + $0x50] sm:$0xff]  ;;  %v1054_v49 = vld [vmem:[%s1796_s1 + $0x48] sm:$0xff] }
   0xc   :  { %1180 = vmatprep.subr.mxu1 %v144_v7  ;;  %1200 = vmatpush3.msra.mxu0 %v1045_v29  ;;  %v1053_v50 = vld [vmem:[%s1796_s1 + $0x40] sm:$0xff]  ;;  %v1066_v51 = vld [vmem:[%s1797_s2 + $0x58] sm:$0xff]  ;;  %v1065_v4 = vld [vmem:[%s1797_s2 + $0x50] sm:$0xff] }
   0xd   :  { %1181 = vmatpush3.msra.mxu1 %v144_v7  ;;  %1201 = vmatprep.subr.mxu0 %v1044_v30  ;;  %v1064_v6 = vld [vmem:[%s1797_s2 + $0x48] sm:$0xff]  ;;  %v1063_v7 = vld [vmem:[%s1797_s2 + $0x40] sm:$0xff]  ;;  %v1086_v29 = vld [vmem:[%s1797_s2 + $0x78] sm:$0xff] }
   0xe   :  { %1182 = vmatprep.subr.mxu1 %v143_v8  ;;  %1202 = vmatpush3.msra.mxu0 %v1044_v30 }
   0xf   :  { %1183 = vmatpush3.msra.mxu1 %v143_v8  ;;  %1203 = vmatprep.subr.mxu0 %v1043_v31 }
  0x10   :  { %1184 = vmatprep.subr.mxu1 %v142_v9  ;;  %1204 = vmatpush3.msra.mxu0 %v1043_v31 }
  0x11   :  { %1185 = vmatpush3.msra.mxu1 %v142_v9  ;;  %1208 = vmatprep.subr.mxu0 %v1060_v36 }
  0x12   :  { %1186 = vmatprep.subr.mxu1 %v141_v10 }
  0x13   :  { %1187 = vmatpush3.msra.mxu1 %v141_v10 }
  0x14   :  { %1188 = vmatprep.subr.mxu1 %v140_v18 }
  0x15   :  { %1189 = vmatpush3.msra.mxu1 %v140_v18  ;;  %v1070_v18 = vld [vmem:[%s1798_s3 + $0x2] ss:$0 sm:$0xff] }
  0x16   :  { %1190 = vmatprep.subr.mxu1 %v139_v19 }
  0x17   :  { %1191 = vmatpush3.msra.mxu1 %v139_v19 }
  0x18   :  { %1192 = vmatprep.subr.mxu1 %v138_v20 }
  0x19   :  { %1193 = vmatpush3.msra.mxu1 %v138_v20 }
  0x1a   :  { %1227 = vmatprep.subr.mxu1 %v1066_v51 }
  0xca   :  { %v1177_v11 = vpop.f32.mrf.mxu1 }
  0xcb   :  { %v124_v15 = vadd.f32 %v1177_v11, %v1038_v12 }
  0xcc   :  { %v107_v13 = vpop.f32.mrf.mxu1 }
  0xcd   :  { %v123_v14 = vadd.f32 %v1038_v12, %v107_v13  ;;  %v129_v17 = vsel %vm125_vm1, %v124_v15, inf  ;;  %v1080_v12 = vld [vmem:[%s1796_s1 + $0xb8] sm:$0xff]  ;;  %v1079_v13 = vld [vmem:[%s1796_s1 + $0xb0] sm:$0xff]  ;;  %v1077_v15 = vld [vmem:[%s1796_s1 + $0xa0] sm:$0xff] }
  0xcf   :  { %v126_v16 = vsel %vm125_vm1, %v123_v14, inf  ;;  %v1078_v14 = vld [vmem:[%s1796_s1 + $0xa8] sm:$0xff] }
  0xd0   :  { %127 = vmin.index.xlane.f32.xlu0 %v126_v16  ;;  %v1076_v16 = vld [vmem:[%s1796_s1 + $0x98] sm:$0xff] }
  0xd4   :  { %130 = vmin.index.xlane.f32.xlu0 %v129_v17  ;;  %v1075_v17 = vld [vmem:[%s1796_s1 + $0x90] sm:$0xff] }
 0x159   :  { %v1496_v24 = vpop.xlane.xlu0 %127 }
 0x15a   :  { %vm132_vm2 = vcmp.eq.s32.totalorder %v1494_v23, %v1496_v24  ;;  %v933_v59 = vrot.slane %v1496_v24, %v1578_v55 }
 0x15b   :  { %v1039_v26 = vsel %vm132_vm2, 1.0, %v1388_v25 }
 0x15c   :  { %1194 = vmatprep.mubr.msk.f32.mxu1 %vm125_vm1, %v1039_v26 }
 0x15d   :  { %v1502_v27 = vpop.xlane.xlu0 %130 }
 0x15e   :  { %vm133_vm3 = vcmp.eq.s32.totalorder %v1494_v23, %v1502_v27  ;;  %v938_v58 = vrot.slane %v1502_v27, %v1574_v54  ;;  %v1074_v27 = vld [vmem:[%s1796_s1 + $0x88] sm:$0xff] }
 0x15f   :  { %v1040_v28 = vsel %vm133_vm3, 1.0, %v1388_v25 }
 0x160   :  { %1195 = vmatmul.mubr.msk.f32.vlgmr.msra.gmra.mxu1 %vm125_vm1, %v1040_v28  ;;  %v940_v0 = vsel %vm939_vm5, %v938_v58, %v933_v59  ;;  %v1073_v28 = vld [vmem:[%s1796_s1 + $0x80] sm:$0xff]  ;;  %v1099_v58 = vld [vmem:[%s1796_s1 + $0xf0] sm:$0xff]  ;;  %v1098_v59 = vld [vmem:[%s1796_s1 + $0xe8] sm:$0xff] }
 0x161   :  { %1228 = vmatpush3.msra.mxu1 %v1066_v51 }
 0x162   :  { %1229 = vmatprep.subr.mxu1 %v1065_v4 }
 0x163   :  { %1230 = vmatpush3.msra.mxu1 %v1065_v4  ;;  %v1090_v4 = vld [vmem:[%s1798_s3 + $0x3] ss:$0 sm:$0xff] }
 0x164   :  { %1231 = vmatprep.subr.mxu1 %v1064_v6 }
 0x165   :  { %1232 = vmatpush3.msra.mxu1 %v1064_v6 }
 0x166   :  { %1233 = vmatprep.subr.mxu1 %v1063_v7 }
 0x167   :  { %1234 = vmatpush3.msra.mxu1 %v1063_v7 }
 0x168   :  { %1238 = vmatprep.subr.mxu1 %v1080_v12 }
 0x220   :  { %v1517_v32 = vpop.f32.mrf.mxu1 }
 0x221   :  { %v1521_v33 = vsub.f32 %v1457_v5, %v1517_v32  ;;  %v228_v6 = vsub.f32 %v1517_v32, %v1457_v5 }
 0x222   :  { %v1523_v34 = vpop.f32.mrf.mxu1 }
 0x223   :  { %254 = vst.msk [vmem:[#allocation7 + $0x8] sm:$0xff] %vm34_vm0, %v1521_v33  ;;  %v1529_v35 = vsub.f32 %v1444_v2, %v1523_v34 }
 0x225   :  { %253 = vst.msk [vmem:[#allocation7] sm:$0xff] %vm34_vm0, %v1529_v35  ;;  %1205 = vmatprep.mubr.msk.f32.mxu0 %vm34_vm0, %v1529_v35 }
 0x226   :  { %1206 = vmatmul.mubr.msk.f32.vlgmr.msra.gmra.mxu0 %vm34_vm0, %v1521_v33 }
 0x227   :  { %1209 = vmatpush3.msra.mxu0 %v1060_v36 }
 0x228   :  { %1210 = vmatprep.subr.mxu0 %v1059_v37 }
 0x229   :  { %1211 = vmatpush3.msra.mxu0 %v1059_v37 }
 0x22a   :  { %1212 = vmatprep.subr.mxu0 %v1058_v38 }
 0x22b   :  { %1213 = vmatpush3.msra.mxu0 %v1058_v38  ;;  %v1085_v38 = vld [vmem:[%s1797_s2 + $0x70] sm:$0xff] }
 0x22c   :  { %1214 = vmatprep.subr.mxu0 %v1057_v39 }
 0x22d   :  { %1215 = vmatpush3.msra.mxu0 %v1057_v39  ;;  %v1084_v39 = vld [vmem:[%s1797_s2 + $0x68] sm:$0xff] }
 0x22e   :  { %1216 = vmatprep.subr.mxu0 %v1056_v40 }
 0x22f   :  { %1217 = vmatpush3.msra.mxu0 %v1056_v40  ;;  %v1083_v40 = vld [vmem:[%s1797_s2 + $0x60] sm:$0xff] }
 0x230   :  { %1218 = vmatprep.subr.mxu0 %v1055_v48 }
 0x231   :  { %1219 = vmatpush3.msra.mxu0 %v1055_v48 }
 0x232   :  { %1220 = vmatprep.subr.mxu0 %v1054_v49 }
 0x233   :  { %1221 = vmatpush3.msra.mxu0 %v1054_v49 }
 0x234   :  { %1222 = vmatprep.subr.mxu0 %v1053_v50 }
 0x235   :  { %1223 = vmatpush3.msra.mxu0 %v1053_v50 }
 0x236   :  { %1257 = vmatprep.subr.mxu0 %v1086_v29 }
 0x2e6   :  { %v1207_v41 = vpop.f32.mrf.mxu0 }
 0x2e7   :  { %v350_v45 = vadd.f32 %v1207_v41, %v1050_v42 }
 0x2e8   :  { %v332_v43 = vpop.f32.mrf.mxu0 }
 0x2e9   :  { %v349_v44 = vadd.f32 %v1050_v42, %v332_v43  ;;  %v354_v47 = vsel %vm125_vm1, %v350_v45, inf }
 0x2eb   :  { %v351_v46 = vsel %vm125_vm1, %v349_v44, inf }
 0x2ec   :  { %352 = vmin.index.xlane.f32.xlu1 %v351_v46 }
 0x2f0   :  { %355 = vmin.index.xlane.f32.xlu1 %v354_v47 }
 0x375   :  { %v353_v56 = vpop.xlane.xlu1 %352 }
 0x376   :  { %vm357_vm4 = vcmp.eq.s32.totalorder %v1494_v23, %v353_v56  ;;  %v944_v61 = vrot.slane %v353_v56, %v1578_v55 }
 0x377   :  { %v1051_v57 = vsel %vm357_vm4, 1.0, %v1388_v25 }
 0x378   :  { %1224 = vmatprep.mubr.msk.f32.mxu0 %vm125_vm1, %v1051_v57  ;;  %v1100_v57 = vld [vmem:[%s1796_s1 + $0xf8] sm:$0xff] }
 0x379   :  { %v356_v60 = vpop.xlane.xlu1 %355 }
 0x37a   :  { %vm358_vm6 = vcmp.eq.s32.totalorder %v1494_v23, %v356_v60  ;;  %v948_v62 = vrot.slane %v356_v60, %v1574_v54  ;;  %v1097_v60 = vld [vmem:[%s1796_s1 + $0xe0] sm:$0xff] }
 0x37b   :  { %v1052_v63 = vsel %vm358_vm6, 1.0, %v1388_v25 }
 0x37c   :  { %v949_v1 = vsel %vm939_vm5, %v948_v62, %v944_v61  ;;  %1225 = vmatmul.mubr.msk.f32.vlgmr.msra.gmra.mxu0 %vm125_vm1, %v1052_v63  ;;  %v1096_v61 = vld [vmem:[%s1796_s1 + $0xd8] sm:$0xff]  ;;  %v1095_v62 = vld [vmem:[%s1796_s1 + $0xd0] sm:$0xff] }
 0x37d   :  { %v1594_v3 = vsel %vm968_vm7, %v940_v0, %v949_v1  ;;  %1258 = vmatpush3.msra.mxu0 %v1086_v29  ;;  %v227_v0 = vsub.f32 %v1523_v34, %v1444_v2 }
 0x37e   :  { %1259 = vmatprep.subr.mxu0 %v1085_v38 }
 0x37f   :  { %1260 = vmatpush3.msra.mxu0 %v1085_v38 }
 0x380   :  { %1261 = vmatprep.subr.mxu0 %v1084_v39 }
 0x381   :  { %1262 = vmatpush3.msra.mxu0 %v1084_v39 }
 0x382   :  { %1263 = vmatprep.subr.mxu0 %v1083_v40 }
 0x383   :  { %1264 = vmatpush3.msra.mxu0 %v1083_v40 }
 0x384   :  { %1268 = vmatprep.subr.mxu0 %v1100_v57 }
 0x43c   :  { %v1605_v8 = vpop.f32.mrf.mxu0 }
 0x43d   :  { %v1609_v9 = vsub.f32 %v1521_v33, %v1605_v8  ;;  %v475_v41 = vadd.f32 %v1605_v8, %v1517_v32  ;;  %v454_v1 = vsub.f32 %v1605_v8, %v1521_v33 }
 0x43e   :  { %v1611_v10 = vpop.f32.mrf.mxu0 }
 0x43f   :  { %480 = vst.msk [vmem:[#allocation7 + $0x18] sm:$0xff] %vm34_vm0, %v1609_v9  ;;  %v1617_v11 = vsub.f32 %v1529_v35, %v1611_v10  ;;  %v453_v63 = vsub.f32 %v1611_v10, %v1529_v35  ;;  %v230_v35 = vmul.f32 %v228_v6, %v228_v6 }
 0x441   :  { %479 = vst.msk [vmem:[#allocation7 + $0x10] sm:$0xff] %vm34_vm0, %v1617_v11  ;;  %1235 = vmatprep.mubr.msk.f32.mxu1 %vm34_vm0, %v1617_v11  ;;  %v455_v7 = vmul.f32 %v453_v63, %v453_v63  ;;  %v232_v32 = vsel %vm34_vm0, %v230_v35, 0.0  ;;  %v474_v63 = vadd.f32 %v1611_v10, %v1523_v34 }
 0x442   :  { %1236 = vmatmul.mubr.msk.f32.vlgmr.msra.gmra.mxu1 %vm34_vm0, %v1609_v9 }
 0x443   :  { %1239 = vmatpush3.msra.mxu1 %v1080_v12  ;;  %v456_v12 = vmul.f32 %v454_v1, %v454_v1 }
 0x444   :  { %1240 = vmatprep.subr.mxu1 %v1079_v13 }
 0x445   :  { %1241 = vmatpush3.msra.mxu1 %v1079_v13  ;;  %v458_v8 = vsel %vm34_vm0, %v456_v12, 0.0 }
 0x446   :  { %1242 = vmatprep.subr.mxu1 %v1078_v14 }
 0x447   :  { %1243 = vmatpush3.msra.mxu1 %v1078_v14 }
 0x448   :  { %1244 = vmatprep.subr.mxu1 %v1077_v15 }
 0x449   :  { %1245 = vmatpush3.msra.mxu1 %v1077_v15 }
 0x44a   :  { %1246 = vmatprep.subr.mxu1 %v1076_v16 }
 0x44b   :  { %1247 = vmatpush3.msra.mxu1 %v1076_v16  ;;  %v457_v16 = vsel %vm34_vm0, %v455_v7, 0.0 }
 0x44c   :  { %1248 = vmatprep.subr.mxu1 %v1075_v17  ;;  %v459_v5 = vadd.f32 %v458_v8, %v457_v16 }
 0x44d   :  { %1249 = vmatpush3.msra.mxu1 %v1075_v17 }
 0x44e   :  { %1250 = vmatprep.subr.mxu1 %v1074_v27 }
 0x44f   :  { %1251 = vmatpush3.msra.mxu1 %v1074_v27 }
 0x450   :  { %1252 = vmatprep.subr.mxu1 %v1073_v28 }
 0x451   :  { %1253 = vmatpush3.msra.mxu1 %v1073_v28 }
 0x502   :  { %v1237_v19 = vpop.f32.mrf.mxu1 }
 0x503   :  { %v576_v20 = vadd.f32 %v1237_v19, %v1070_v18  ;;  %v1094_v19 = vld [vmem:[%s1796_s1 + $0xc8] sm:$0xff] }
 0x504   :  { %v558_v21 = vpop.f32.mrf.mxu1 }
 0x505   :  { %v575_v22 = vadd.f32 %v1070_v18, %v558_v21  ;;  %v580_v24 = vsel %vm125_vm1, %v576_v20, inf  ;;  %v1093_v20 = vld [vmem:[%s1796_s1 + $0xc0] sm:$0xff]  ;;  %s1389_s1 = smov [#allocation4]  }
 0x506   :  { %581 = vmin.index.xlane.f32.xlu1 %v580_v24  ;;  %s995_s11 = sshll.u32 %s1389_s1, 4  ;;  %s996_s11 = int_to_ptr.vmem [resolvable:$true] %s995_s11 }
 0x507   :  { %v577_v26 = vsel %vm125_vm1, %v575_v22, inf  ;;  %s1302_s14 = scalar_lea.vmem %s996_s11, 64  ;;  %p1307_p1 = scmp.lt.s32.totalorder %s996_s11, %s996_s11 }
 0x508   :  { %578 = vmin.index.xlane.f32.xlu0 %v577_v26  ;;  %p1303_p0 = scmp.ne.s32.totalorder %s996_s11, %s1302_s14  ;;  %p1308_p2 = scmp.lt.s32.totalorder %s1302_s14, %s1302_s14 }
 0x50a   :  { %p1309_p3 = por %p1308_p2, %p1307_p1 }
 0x50c   :  { %p1310_p4 = pnand %p1309_p3, %p1303_p0 }
 0x58f   :  { %v1657_v30 = vpop.xlane.xlu1 %581 }
 0x590   :  { %vm584_vm8 = vcmp.eq.s32.totalorder %v1494_v23, %v1657_v30  ;;  %v957_v22 = vrot.slane %v1657_v30, %v1574_v54 }
 0x591   :  { %v1661_v31 = vpop.xlane.xlu0 %578  ;;  %v1072_v37 = vsel %vm584_vm8, 1.0, %v1388_v25 }
 0x592   :  { %vm583_vm9 = vcmp.eq.s32.totalorder %v1494_v23, %v1661_v31  ;;  %v953_v21 = vrot.slane %v1661_v31, %v1578_v55 }
 0x593   :  { %v1071_v36 = vsel %vm583_vm9, 1.0, %v1388_v25 }
 0x594   :  { %1254 = vmatprep.mubr.msk.f32.mxu1 %vm125_vm1, %v1071_v36  ;;  %v958_v27 = vsel %vm939_vm5, %v957_v22, %v953_v21 }
 0x595   :  { %1255 = vmatmul.mubr.msk.f32.vlgmr.msra.gmra.mxu1 %vm125_vm1, %v1072_v37  ;;  %v971_v39 = vsel %vm970_vm11, %v1594_v3, %v958_v27 }
 0x655   :  { %v1256_v42 = vpop.f32.mrf.mxu1 }
 0x656   :  { %v680_v43 = vsub.f32 %v1256_v42, %v1609_v9  ;;  %v1681_v44 = vadd.f32 %v1256_v42, %v475_v41  ;;  %v1684_v45 = vsub.f32 %v1609_v9, %v1256_v42 }
 0x657   :  { %v1686_v46 = vpop.f32.mrf.mxu1 }
 0x658   :  { %v682_v47 = vmul.f32 %v680_v43, %v680_v43  ;;  %706 = vst.msk [vmem:[#allocation7 + $0x28] sm:$0xff] %vm34_vm0, %v1684_v45  ;;  %v679_v48 = vsub.f32 %v1686_v46, %v1617_v11  ;;  %v1694_v49 = vsub.f32 %v1617_v11, %v1686_v46  ;;  %v229_v11 = vmul.f32 %v227_v0, %v227_v0 }
 0x659   :  { %v700_v1 = vadd.f32 %v1686_v46, %v474_v63 }
 0x65a   :  { %v681_v50 = vmul.f32 %v679_v48, %v679_v48  ;;  %705 = vst.msk [vmem:[#allocation7 + $0x20] sm:$0xff] %vm34_vm0, %v1694_v49  ;;  %1265 = vmatprep.mubr.msk.f32.mxu0 %vm34_vm0, %v1694_v49  ;;  %v684_v52 = vsel %vm34_vm0, %v682_v47, 0.0  ;;  %v231_v17 = vsel %vm34_vm0, %v229_v11, 0.0 }
 0x65b   :  { %1266 = vmatmul.mubr.msk.f32.vlgmr.msra.gmra.mxu0 %vm34_vm0, %v1684_v45  ;;  %v233_v18 = vadd.f32 %v232_v32, %v231_v17 }
 0x65c   :  { %v683_v51 = vsel %vm34_vm0, %v681_v50, 0.0  ;;  %1269 = vmatpush3.msra.mxu0 %v1100_v57 }
 0x65d   :  { %v685_v56 = vadd.f32 %v684_v52, %v683_v51  ;;  %1270 = vmatprep.subr.mxu0 %v1099_v58 }
 0x65e   :  { %1271 = vmatpush3.msra.mxu0 %v1099_v58 }
 0x65f   :  { %1272 = vmatprep.subr.mxu0 %v1098_v59 }
 0x660   :  { %1273 = vmatpush3.msra.mxu0 %v1098_v59 }
 0x661   :  { %1274 = vmatprep.subr.mxu0 %v1097_v60 }
 0x662   :  { %1275 = vmatpush3.msra.mxu0 %v1097_v60 }
 0x663   :  { %1276 = vmatprep.subr.mxu0 %v1096_v61 }
 0x664   :  { %1277 = vmatpush3.msra.mxu0 %v1096_v61 }
 0x665   :  { %1278 = vmatprep.subr.mxu0 %v1095_v62 }
 0x666   :  { %1279 = vmatpush3.msra.mxu0 %v1095_v62 }
 0x667   :  { %1280 = vmatprep.subr.mxu0 %v1094_v19 }
 0x668   :  { %1281 = vmatpush3.msra.mxu0 %v1094_v19 }
 0x669   :  { %1282 = vmatprep.subr.mxu0 %v1093_v20 }
 0x66a   :  { %1283 = vmatpush3.msra.mxu0 %v1093_v20 }
 0x71b   :  { %v1267_v9 = vpop.f32.mrf.mxu0 }
 0x71c   :  { %v802_v13 = vadd.f32 %v1267_v9, %v1090_v4 }
 0x71d   :  { %v784_v14 = vpop.f32.mrf.mxu0 }
 0x71e   :  { %v801_v15 = vadd.f32 %v1090_v4, %v784_v14  ;;  %v806_v2 = vsel %vm125_vm1, %v802_v13, inf }
 0x71f   :  { %807 = vmin.index.xlane.f32.xlu1 %v806_v2 }
 0x720   :  { %v803_v33 = vsel %vm125_vm1, %v801_v15, inf }
 0x721   :  { %804 = vmin.index.xlane.f32.xlu0 %v803_v33 }
 0x723   :  { %460 = vadd.xlane.f32.xlu1 %v459_v5 }
 0x725   :  { %234 = vadd.xlane.f32.xlu0 %v233_v18 }
 0x729   :  { %686 = vadd.xlane.f32.xlu0 %v685_v56 }
 0x7a8   :  { %v808_v24 = vpop.xlane.xlu1 %807 }
 0x7a9   :  { %vm810_vm10 = vcmp.eq.s32.totalorder %v1494_v23, %v808_v24  ;;  %v966_v28 = vrot.slane %v808_v24, %v1574_v54 }
 0x7aa   :  { %v805_v26 = vpop.xlane.xlu0 %804  ;;  %v1092_v30 = vsel %vm810_vm10, 1.0, %v1388_v25 }
 0x7ab   :  { %vm809_vm12 = vcmp.eq.s32.totalorder %v1494_v23, %v805_v26  ;;  %v962_v29 = vrot.slane %v805_v26, %v1578_v55 }
 0x7ac   :  { %v1091_v36 = vsel %vm809_vm12, 1.0, %v1388_v25  ;;  %v461_v31 = vpop.xlane.xlu1 %460 }
 0x7ad   :  { %v462_v37 = vrot.slane %v461_v31, 4  ;;  %1284 = vmatprep.mubr.msk.f32.mxu0 %vm125_vm1, %v1091_v36  ;;  %v967_v38 = vsel %vm939_vm5, %v966_v28, %v962_v29 }
 0x7ae   :  { %1285 = vmatmul.mubr.msk.f32.vlgmr.msra.gmra.mxu0 %vm125_vm1, %v1092_v30  ;;  %v235_v54 = vpop.xlane.xlu0 %234  ;;  %v973_v40 = vsel %vm972_vm13, %v971_v39, %v967_v38 }
 0x7af   :  { %v463_v41 = vadd.f32 %v462_v37, %v461_v31  ;;  %v236_v55 = vrot.slane %v235_v54, 4  ;;  %975 = vst.msk [vmem:[#allocation4] sm:$0xf] %vm974_vm14, %v973_v40 }
 0x7b1   :  { %v464_v42 = vrot.slane %v463_v41, 2  ;;  %v237_v43 = vadd.f32 %v236_v55, %v235_v54 }
 0x7b2   :  { %v687_v47 = vpop.xlane.xlu0 %686 }
 0x7b3   :  { %v238_v48 = vrot.slane %v237_v43, 2  ;;  %v688_v50 = vrot.slane %v687_v47, 4  ;;  %v465_v25 = vadd.f32 %v464_v42, %v463_v41 }
 0x7b5   :  { %v689_v51 = vadd.f32 %v688_v50, %v687_v47  ;;  %v239_v52 = vadd.f32 %v238_v48, %v237_v43  ;;  %v466_v56 = vrot.slane %v465_v25, 1 }
 0x7b7   :  { %v690_v57 = vrot.slane %v689_v51, 2  ;;  %v240_v58 = vrot.slane %v239_v52, 1  ;;  %v467_v60 = vadd.f32 %v466_v56, %v465_v25 }
 0x7b9   :  { %v691_v59 = vadd.f32 %v690_v57, %v689_v51  ;;  %v241_v3 = vadd.f32 %v240_v58, %v239_v52 }
 0x7bb   :  { %1287 = vpush %v241_v3  ;;  %v692_v61 = vrot.slane %v691_v59, 1 }
 0x7bc   :  { %1289 = vpush %v467_v60 }
 0x7bd   :  { %v693_v62 = vadd.f32 %v692_v61, %v691_v59 }
 0x7bf   :  { %1291 = vpush %v693_v62 }
 0x86e   :  { %v1286_v0 = vpop.f32.mrf.mxu0 }
 0x86f   :  { %v906_v4 = vsub.f32 %v1286_v0, %v1684_v45  ;;  %v927_v6 = vadd.f32 %v1286_v0, %v1681_v44 }
 0x870   :  { %v896_v7 = vpop.f32.mrf.mxu0 }
 0x871   :  { %v908_v9 = vmul.f32 %v906_v4, %v906_v4  ;;  %929 = vst.msk [vmem:[#allocation2 + $0x8] sm:$0xff] %vm34_vm0, %v927_v6  ;;  %v905_v11 = vsub.f32 %v896_v7, %v1694_v49  ;;  %v926_v12 = vadd.f32 %v896_v7, %v700_v1 }
 0x873   :  { %v907_v13 = vmul.f32 %v905_v11, %v905_v11  ;;  %928 = vst.msk [vmem:[#allocation2] sm:$0xff] %vm34_vm0, %v926_v12  ;;  %v910_v34 = vsel %vm34_vm0, %v908_v9, 0.0 }
 0x875   :  { %v909_v14 = vsel %vm34_vm0, %v907_v13, 0.0 }
 0x876   :  { %v911_v10 = vadd.f32 %v910_v34, %v909_v14 }
 0x878   :  { %912 = vadd.xlane.f32.xlu1 %v911_v10 }
 0x879   :  { %1313 = shalt.err (!%p1310_p4)
}
 0x87a   :  { %998 = dma.vmem_to_hbm [thread:$0]  %s996_s11, 64, %s1800_s5, [#allocation5]  }
 0x87b   :  { %s1322_s17 = scalar_lea.vmem %s983_s13, 256  ;;  %p1327_p6 = scmp.lt.s32.totalorder %s983_s13, %s983_s13 }
 0x87c   :  { %p1323_p5 = scmp.ne.s32.totalorder %s983_s13, %s1322_s17  ;;  %p1328_p7 = scmp.lt.s32.totalorder %s1322_s17, %s1322_s17 }
 0x87e   :  { %p1329_p8 = por %p1328_p7, %p1327_p6 }
 0x880   :  { %p1330_p9 = pnand %p1329_p8, %p1323_p5 }
 0x882   :  { %1333 = shalt.err (!%p1330_p9)
}
 0x883   :  { %s1391_s18 = smov 128   ;;  %s1392_s2 = smov 8  }
 0x884   :  { %988 = dma.vmem_to_hbm [thread:$0]  %s983_s13, 256, %s1799_s4, [#allocation3], %s1391_s18, %s1391_s18, %s1392_s2  }
 0x885   :  { %s1393_s20 = smov [#allocation7]  }
 0x886   :  { %s1014_s21 = sshll.u32 %s1393_s20, 4  ;;  %s1015_s21 = int_to_ptr.vmem [resolvable:$true] %s1014_s21 }
 0x887   :  { %s1342_s22 = scalar_lea.vmem %s1015_s21, 768  ;;  %p1347_p11 = scmp.lt.s32.totalorder %s1015_s21, %s1015_s21 }
 0x888   :  { %p1343_p10 = scmp.ne.s32.totalorder %s1015_s21, %s1342_s22  ;;  %p1348_p12 = scmp.lt.s32.totalorder %s1342_s22, %s1342_s22 }
 0x88a   :  { %p1349_p13 = por %p1348_p12, %p1347_p11 }
 0x88c   :  { %p1350_p0 = pnand %p1349_p13, %p1343_p10 }
 0x88e   :  { %1353 = shalt.err (!%p1350_p0)
}
 0x88f   :  { %1020 = dma.vmem_to_hbm [thread:$0]  %s1015_s21, 768, %s1802_s7, [#allocation8], %s1391_s18, %s1391_s18, %s1392_s2   ;;  %vm243_vm15 = vcmp.eq.s32.totalorder %v1571_v53, 0  ;;  %vm244_vm0 = vcmp.eq.s32.totalorder %v1494_v23, 0  ;;  %vm469_vm1 = vcmp.eq.s32.totalorder %v1494_v23, 1  ;;  %vm695_vm3 = vcmp.eq.s32.totalorder %v1494_v23, 2 }
 0x890   :  { %s1288_s4 = spop %1287  ;;  %vm245_vm2 = vmand %vm243_vm15, %vm244_vm0  ;;  %vm921_vm6 = vcmp.eq.s32.totalorder %v1494_v23, 3  ;;  %s1394_s26 = smov [#allocation6]  }
 0x891   :  { %s1290_s24 = spop %1289  ;;  %v246_v16 = vstv %s1288_s4  ;;  %vm470_vm4 = vmand %vm243_vm15, %vm469_vm1  ;;  %s1005_s27 = sshll.u32 %s1394_s26, 4  ;;  %s1006_s27 = int_to_ptr.vmem [resolvable:$true] %s1005_s27 }
 0x892   :  { %s1292_s7 = spop %1291  ;;  %v471_v33 = vstv %s1290_s24  ;;  %vm696_vm5 = vmand %vm243_vm15, %vm695_vm3  ;;  %v247_v17 = vsel %vm245_vm2, %v246_v16, 0.0  ;;  %s1362_s28 = scalar_lea.vmem %s1006_s27, 128 }
 0x893   :  { %v697_v8 = vstv %s1292_s7  ;;  %v472_v5 = vsel %vm470_vm4, %v471_v33, 0.0  ;;  %vm922_vm7 = vmand %vm243_vm15, %vm921_vm6  ;;  %p1363_p1 = scmp.ne.s32.totalorder %s1006_s27, %s1362_s28  ;;  %p1367_p2 = scmp.lt.s32.totalorder %s1006_s27, %s1006_s27 }
 0x894   :  { %v698_v32 = vsel %vm696_vm5, %v697_v8, 0.0  ;;  %v473_v18 = vadd.f32 %v472_v5, %v247_v17  ;;  %p1368_p3 = scmp.lt.s32.totalorder %s1362_s28, %s1362_s28 }
 0x896   :  { %v699_v19 = vadd.f32 %v698_v32, %v473_v18  ;;  %p1369_p4 = por %p1368_p3, %p1367_p2 }
 0x898   :  { %p1370_p5 = pnand %p1369_p4, %p1363_p1 }
 0x901   :  { %v913_v44 = vpop.xlane.xlu1 %912 }
 0x902   :  { %v914_v45 = vrot.slane %v913_v44, 4 }
 0x904   :  { %v915_v46 = vadd.f32 %v914_v45, %v913_v44 }
 0x906   :  { %v916_v49 = vrot.slane %v915_v46, 2 }
 0x908   :  { %v917_v35 = vadd.f32 %v916_v49, %v915_v46 }
 0x90a   :  { %v918_v15 = vrot.slane %v917_v35, 1 }
 0x90c   :  { %v919_v2 = vadd.f32 %v918_v15, %v917_v35 }
 0x90e   :  { %1293 = vpush %v919_v2 }
 0x93f   :  { %s1294_s25 = spop %1293 }
 0x940   :  { %v923_v20 = vstv %s1294_s25 }
 0x941   :  { %v924_v21 = vsel %vm922_vm7, %v923_v20, 0.0 }
 0x942   :  { %v925_v22 = vadd.f32 %v924_v21, %v699_v19 }
 0x944   :  { %976 = vst [vmem:[#allocation6] sm:$0xff] %v925_v22 }
 0x945   :  { %1373 = shalt.err (!%p1370_p5)
}
 0x946   :  { %1008 = dma.vmem_to_hbm [thread:$0]  %s1006_s27, 128, %s1801_s6, [#allocation5]  }
 0x947   :  { %1382 = dma.done.wait [#allocation3], 256  }
 0x948   :  { %1383 = vsyncadd [#allocation3], 4294967040 }
 0x949   :  { %1384 = dma.done.wait [#allocation5], 192  }
 0x94a   :  { %1385 = vsyncadd [#allocation5], 4294967104 }
 0x94b   :  { %1386 = dma.done.wait [#allocation8], 768  }
 0x94c   :  { %1387 = vsyncadd [#allocation8], 4294966528 }
 0x94d   :  { %1033 = vsyncpa [#allocation3], 1 }
 0x94e   :  { %1034 = vsyncpa [#allocation5], 1 }
 0x94f   :  { %1035 = vsyncpa [#allocation8], 1 }

// kernel: tpu_custom_call.1
= control target key start
LH: loop header
LB: loop body
LE: loop exit
PB: predicated region body
PF: predicated region fallthrough
CT: control target
= control target key end

     0   :  { %13 = vsyncpa [#allocation3], 0  ;;  %s1795_s0 = inlined_call_operand.vmem [shape: f32[16,32], index: 0, kind: input, shape index: {}]   ;;  %s1796_s1 = inlined_call_operand.vmem [shape: f32[4,64,32], index: 1, kind: input, shape index: {}]   ;;  %s1797_s2 = inlined_call_operand.vmem [shape: f32[4,32,64], index: 2, kind: input, shape index: {}]   ;;  %s1798_s3 = inlined_call_operand.vmem [shape: f32[4,1,64], index: 3, kind: input, shape index: {}]   ;;  %s1799_s4 = inlined_call_operand.hbm [shape: f32[16,32], index: 4, kind: output, shape index: {0}]   ;;  %s1800_s5 = inlined_call_operand.hbm [shape: s32[4,16], index: 5, kind: output, shape index: {1}]   ;;  %s1801_s6 = inlined_call_operand.hbm [shape: f32[1,8,128], index: 6, kind: output, shape index: {2}]   ;;  %s1802_s7 = inlined_call_operand.hbm [shape: f32[3,16,32], index: 7, kind: output, shape index: {3}]  }
   0x1   :  { %14 = vsyncpa [#allocation5], 0  ;;  %v33_v0 = vld [vmem:[%s1797_s2 + $0x18] sm:$0xff]  ;;  %v32_v1 = vld [vmem:[%s1797_s2 + $0x10] sm:$0xff]  ;;  %vm34_vm0 = vcmask 261120  }
   0x2   :  { %1167 = vmatprep.subr.mxu1 %v33_v0  ;;  %v1444_v2 = vld [vmem:[%s1795_s0] sm:$0xff]  ;;  %v31_v3 = vld [vmem:[%s1797_s2 + $0x8] sm:$0xff] }
   0x3   :  { %1168 = vmatpush3.msra.mxu1 %v33_v0  ;;  %1175 = vmatprep.mubr.msk.f32.mxu1 %vm34_vm0, %v1444_v2 }
   0x4   :  { %15 = vsyncpa [#allocation8], 0  ;;  %1169 = vmatprep.subr.mxu1 %v32_v1  ;;  %v30_v4 = vld [vmem:[%s1797_s2] sm:$0xff]  ;;  %v1457_v5 = vld [vmem:[%s1795_s0 + $0x8] sm:$0xff]  ;;  %vm125_vm1 = vcmask 523264   ;;  %v26_v22 = vlaneseq  ;;  %v1388_v25 = vmov 0.0  }
   0x5   :  { %1170 = vmatpush3.msra.mxu1 %v32_v1  ;;  %v145_v6 = vld [vmem:[%s1796_s1 + $0x38] sm:$0xff]  ;;  %v144_v7 = vld [vmem:[%s1796_s1 + $0x30] sm:$0xff]  ;;  %v143_v8 = vld [vmem:[%s1796_s1 + $0x28] sm:$0xff]  ;;  %vm939_vm5 = vcmask 130112   ;;  %vm968_vm7 = vcmask 1040384   ;;  %vm970_vm11 = vcmask 1041408  }
   0x6   :  { %1171 = vmatprep.subr.mxu1 %v31_v3  ;;  %v142_v9 = vld [vmem:[%s1796_s1 + $0x20] sm:$0xff]  ;;  %v141_v10 = vld [vmem:[%s1796_s1 + $0x18] sm:$0xff]  ;;  %v140_v18 = vld [vmem:[%s1796_s1 + $0x10] sm:$0xff]  ;;  %v1494_v23 = vand.u32 127, %v26_v22  ;;  %v1571_v53 = vshrl.u32 %v26_v22, 7  ;;  %vm972_vm13 = vcmask 1042432  }
   0x7   :  { %1172 = vmatpush3.msra.mxu1 %v31_v3  ;;  %v1038_v12 = vld [vmem:[%s1798_s3] ss:$0 sm:$0xff]  ;;  %v139_v19 = vld [vmem:[%s1796_s1 + $0x8] sm:$0xff]  ;;  %v1046_v21 = vld [vmem:[%s1797_s2 + $0x38] sm:$0xff]  ;;  %vm974_vm14 = vcmask 125952   ;;  %s1390_s12 = smov [#allocation2]  }
   0x8   :  { %1173 = vmatprep.subr.mxu1 %v30_v4  ;;  %v138_v20 = vld [vmem:[%s1796_s1] sm:$0xff]  ;;  %1197 = vmatprep.subr.mxu0 %v1046_v21  ;;  %v1045_v29 = vld [vmem:[%s1797_s2 + $0x30] sm:$0xff]  ;;  %v1044_v30 = vld [vmem:[%s1797_s2 + $0x28] sm:$0xff]  ;;  %v934_v52 = vadd.s32 4294967288, %v1494_v23  ;;  %v1578_v55 = vsub.s32 %v1494_v23, %v1571_v53  ;;  %s982_s13 = sshll.u32 %s1390_s12, 4  ;;  %s983_s13 = int_to_ptr.vmem [resolvable:$true] %s982_s13 }
   0x9   :  { %1174 = vmatpush3.msra.mxu1 %v30_v4  ;;  %1198 = vmatpush3.msra.mxu0 %v1046_v21  ;;  %v1043_v31 = vld [vmem:[%s1797_s2 + $0x20] sm:$0xff]  ;;  %v1060_v36 = vld [vmem:[%s1796_s1 + $0x78] sm:$0xff]  ;;  %v1059_v37 = vld [vmem:[%s1796_s1 + $0x70] sm:$0xff] }
   0xa   :  { %1176 = vmatmul.mubr.msk.f32.vlgmr.msra.gmra.mxu1 %vm34_vm0, %v1457_v5  ;;  %1178 = vmatprep.subr.mxu1 %v145_v6  ;;  %v1058_v38 = vld [vmem:[%s1796_s1 + $0x68] sm:$0xff]  ;;  %v1057_v39 = vld [vmem:[%s1796_s1 + $0x60] sm:$0xff]  ;;  %v1056_v40 = vld [vmem:[%s1796_s1 + $0x58] sm:$0xff]  ;;  %v1574_v54 = vsub.s32 %v934_v52, %v1571_v53 }
   0xb   :  { %1179 = vmatpush3.msra.mxu1 %v145_v6  ;;  %1199 = vmatprep.subr.mxu0 %v1045_v29  ;;  %v1050_v42 = vld [vmem:[%s1798_s3 + $0x1] ss:$0 sm:$0xff]  ;;  %v1055_v48 = vld [vmem:[%s1796_s1 + $0x50] sm:$0xff]  ;;  %v1054_v49 = vld [vmem:[%s1796_s1 + $0x48] sm:$0xff] }
   0xc   :  { %1180 = vmatprep.subr.mxu1 %v144_v7  ;;  %1200 = vmatpush3.msra.mxu0 %v1045_v29  ;;  %v1053_v50 = vld [vmem:[%s1796_s1 + $0x40] sm:$0xff]  ;;  %v1066_v51 = vld [vmem:[%s1797_s2 + $0x58] sm:$0xff]  ;;  %v1065_v4 = vld [vmem:[%s1797_s2 + $0x50] sm:$0xff] }
   0xd   :  { %1181 = vmatpush3.msra.mxu1 %v144_v7  ;;  %1201 = vmatprep.subr.mxu0 %v1044_v30  ;;  %v1064_v6 = vld [vmem:[%s1797_s2 + $0x48] sm:$0xff]  ;;  %v1063_v7 = vld [vmem:[%s1797_s2 + $0x40] sm:$0xff]  ;;  %v1086_v29 = vld [vmem:[%s1797_s2 + $0x78] sm:$0xff] }
   0xe   :  { %1182 = vmatprep.subr.mxu1 %v143_v8  ;;  %1202 = vmatpush3.msra.mxu0 %v1044_v30 }
   0xf   :  { %1183 = vmatpush3.msra.mxu1 %v143_v8  ;;  %1203 = vmatprep.subr.mxu0 %v1043_v31 }
  0x10   :  { %1184 = vmatprep.subr.mxu1 %v142_v9  ;;  %1204 = vmatpush3.msra.mxu0 %v1043_v31 }
  0x11   :  { %1185 = vmatpush3.msra.mxu1 %v142_v9  ;;  %1208 = vmatprep.subr.mxu0 %v1060_v36 }
  0x12   :  { %1186 = vmatprep.subr.mxu1 %v141_v10 }
  0x13   :  { %1187 = vmatpush3.msra.mxu1 %v141_v10 }
  0x14   :  { %1188 = vmatprep.subr.mxu1 %v140_v18 }
  0x15   :  { %1189 = vmatpush3.msra.mxu1 %v140_v18  ;;  %v1070_v18 = vld [vmem:[%s1798_s3 + $0x2] ss:$0 sm:$0xff] }
  0x16   :  { %1190 = vmatprep.subr.mxu1 %v139_v19 }
  0x17   :  { %1191 = vmatpush3.msra.mxu1 %v139_v19 }
  0x18   :  { %1192 = vmatprep.subr.mxu1 %v138_v20 }
  0x19   :  { %1193 = vmatpush3.msra.mxu1 %v138_v20 }
  0x1a   :  { %1227 = vmatprep.subr.mxu1 %v1066_v51 }
  0xca   :  { %v1177_v11 = vpop.f32.mrf.mxu1 }
  0xcb   :  { %v124_v15 = vadd.f32 %v1177_v11, %v1038_v12 }
  0xcc   :  { %v107_v13 = vpop.f32.mrf.mxu1 }
  0xcd   :  { %v123_v14 = vadd.f32 %v1038_v12, %v107_v13  ;;  %v129_v17 = vsel %vm125_vm1, %v124_v15, inf  ;;  %v1080_v12 = vld [vmem:[%s1796_s1 + $0xb8] sm:$0xff]  ;;  %v1079_v13 = vld [vmem:[%s1796_s1 + $0xb0] sm:$0xff]  ;;  %v1077_v15 = vld [vmem:[%s1796_s1 + $0xa0] sm:$0xff] }
  0xcf   :  { %v126_v16 = vsel %vm125_vm1, %v123_v14, inf  ;;  %v1078_v14 = vld [vmem:[%s1796_s1 + $0xa8] sm:$0xff] }
  0xd0   :  { %127 = vmin.index.xlane.f32.xlu0 %v126_v16  ;;  %v1076_v16 = vld [vmem:[%s1796_s1 + $0x98] sm:$0xff] }
  0xd4   :  { %130 = vmin.index.xlane.f32.xlu0 %v129_v17  ;;  %v1075_v17 = vld [vmem:[%s1796_s1 + $0x90] sm:$0xff] }
 0x159   :  { %v1496_v24 = vpop.xlane.xlu0 %127 }
 0x15a   :  { %vm132_vm2 = vcmp.eq.s32.totalorder %v1494_v23, %v1496_v24  ;;  %v933_v59 = vrot.slane %v1496_v24, %v1578_v55 }
 0x15b   :  { %v1039_v26 = vsel %vm132_vm2, 1.0, %v1388_v25 }
 0x15c   :  { %1194 = vmatprep.mubr.msk.f32.mxu1 %vm125_vm1, %v1039_v26 }
 0x15d   :  { %v1502_v27 = vpop.xlane.xlu0 %130 }
 0x15e   :  { %vm133_vm3 = vcmp.eq.s32.totalorder %v1494_v23, %v1502_v27  ;;  %v938_v58 = vrot.slane %v1502_v27, %v1574_v54  ;;  %v1074_v27 = vld [vmem:[%s1796_s1 + $0x88] sm:$0xff] }
 0x15f   :  { %v1040_v28 = vsel %vm133_vm3, 1.0, %v1388_v25 }
 0x160   :  { %1195 = vmatmul.mubr.msk.f32.vlgmr.msra.gmra.mxu1 %vm125_vm1, %v1040_v28  ;;  %v940_v0 = vsel %vm939_vm5, %v938_v58, %v933_v59  ;;  %v1073_v28 = vld [vmem:[%s1796_s1 + $0x80] sm:$0xff]  ;;  %v1099_v58 = vld [vmem:[%s1796_s1 + $0xf0] sm:$0xff]  ;;  %v1098_v59 = vld [vmem:[%s1796_s1 + $0xe8] sm:$0xff] }
 0x161   :  { %1228 = vmatpush3.msra.mxu1 %v1066_v51 }
 0x162   :  { %1229 = vmatprep.subr.mxu1 %v1065_v4 }
 0x163   :  { %1230 = vmatpush3.msra.mxu1 %v1065_v4  ;;  %v1090_v4 = vld [vmem:[%s1798_s3 + $0x3] ss:$0 sm:$0xff] }
 0x164   :  { %1231 = vmatprep.subr.mxu1 %v1064_v6 }
 0x165   :  { %1232 = vmatpush3.msra.mxu1 %v1064_v6 }
 0x166   :  { %1233 = vmatprep.subr.mxu1 %v1063_v7 }
 0x167   :  { %1234 = vmatpush3.msra.mxu1 %v1063_v7 }
 0x168   :  { %1238 = vmatprep.subr.mxu1 %v1080_v12 }
 0x220   :  { %v1517_v32 = vpop.f32.mrf.mxu1 }
 0x221   :  { %v1521_v33 = vsub.f32 %v1457_v5, %v1517_v32  ;;  %v228_v6 = vsub.f32 %v1517_v32, %v1457_v5 }
 0x222   :  { %v1523_v34 = vpop.f32.mrf.mxu1 }
 0x223   :  { %254 = vst.msk [vmem:[#allocation7 + $0x8] sm:$0xff] %vm34_vm0, %v1521_v33  ;;  %v1529_v35 = vsub.f32 %v1444_v2, %v1523_v34 }
 0x225   :  { %253 = vst.msk [vmem:[#allocation7] sm:$0xff] %vm34_vm0, %v1529_v35  ;;  %1205 = vmatprep.mubr.msk.f32.mxu0 %vm34_vm0, %v1529_v35 }
 0x226   :  { %1206 = vmatmul.mubr.msk.f32.vlgmr.msra.gmra.mxu0 %vm34_vm0, %v1521_v33 }
 0x227   :  { %1209 = vmatpush3.msra.mxu0 %v1060_v36 }
 0x228   :  { %1210 = vmatprep.subr.mxu0 %v1059_v37 }
 0x229   :  { %1211 = vmatpush3.msra.mxu0 %v1059_v37 }
 0x22a   :  { %1212 = vmatprep.subr.mxu0 %v1058_v38 }
 0x22b   :  { %1213 = vmatpush3.msra.mxu0 %v1058_v38  ;;  %v1085_v38 = vld [vmem:[%s1797_s2 + $0x70] sm:$0xff] }
 0x22c   :  { %1214 = vmatprep.subr.mxu0 %v1057_v39 }
 0x22d   :  { %1215 = vmatpush3.msra.mxu0 %v1057_v39  ;;  %v1084_v39 = vld [vmem:[%s1797_s2 + $0x68] sm:$0xff] }
 0x22e   :  { %1216 = vmatprep.subr.mxu0 %v1056_v40 }
 0x22f   :  { %1217 = vmatpush3.msra.mxu0 %v1056_v40  ;;  %v1083_v40 = vld [vmem:[%s1797_s2 + $0x60] sm:$0xff] }
 0x230   :  { %1218 = vmatprep.subr.mxu0 %v1055_v48 }
 0x231   :  { %1219 = vmatpush3.msra.mxu0 %v1055_v48 }
 0x232   :  { %1220 = vmatprep.subr.mxu0 %v1054_v49 }
 0x233   :  { %1221 = vmatpush3.msra.mxu0 %v1054_v49 }
 0x234   :  { %1222 = vmatprep.subr.mxu0 %v1053_v50 }
 0x235   :  { %1223 = vmatpush3.msra.mxu0 %v1053_v50 }
 0x236   :  { %1257 = vmatprep.subr.mxu0 %v1086_v29 }
 0x2e6   :  { %v1207_v41 = vpop.f32.mrf.mxu0 }
 0x2e7   :  { %v350_v45 = vadd.f32 %v1207_v41, %v1050_v42 }
 0x2e8   :  { %v332_v43 = vpop.f32.mrf.mxu0 }
 0x2e9   :  { %v349_v44 = vadd.f32 %v1050_v42, %v332_v43  ;;  %v354_v47 = vsel %vm125_vm1, %v350_v45, inf }
 0x2eb   :  { %v351_v46 = vsel %vm125_vm1, %v349_v44, inf }
 0x2ec   :  { %352 = vmin.index.xlane.f32.xlu1 %v351_v46 }
 0x2f0   :  { %355 = vmin.index.xlane.f32.xlu1 %v354_v47 }
 0x375   :  { %v353_v56 = vpop.xlane.xlu1 %352 }
 0x376   :  { %vm357_vm4 = vcmp.eq.s32.totalorder %v1494_v23, %v353_v56  ;;  %v944_v61 = vrot.slane %v353_v56, %v1578_v55 }
 0x377   :  { %v1051_v57 = vsel %vm357_vm4, 1.0, %v1388_v25 }
 0x378   :  { %1224 = vmatprep.mubr.msk.f32.mxu0 %vm125_vm1, %v1051_v57  ;;  %v1100_v57 = vld [vmem:[%s1796_s1 + $0xf8] sm:$0xff] }
 0x379   :  { %v356_v60 = vpop.xlane.xlu1 %355 }
 0x37a   :  { %vm358_vm6 = vcmp.eq.s32.totalorder %v1494_v23, %v356_v60  ;;  %v948_v62 = vrot.slane %v356_v60, %v1574_v54  ;;  %v1097_v60 = vld [vmem:[%s1796_s1 + $0xe0] sm:$0xff] }
 0x37b   :  { %v1052_v63 = vsel %vm358_vm6, 1.0, %v1388_v25 }
 0x37c   :  { %v949_v1 = vsel %vm939_vm5, %v948_v62, %v944_v61  ;;  %1225 = vmatmul.mubr.msk.f32.vlgmr.msra.gmra.mxu0 %vm125_vm1, %v1052_v63  ;;  %v1096_v61 = vld [vmem:[%s1796_s1 + $0xd8] sm:$0xff]  ;;  %v1095_v62 = vld [vmem:[%s1796_s1 + $0xd0] sm:$0xff] }
 0x37d   :  { %v1594_v3 = vsel %vm968_vm7, %v940_v0, %v949_v1  ;;  %1258 = vmatpush3.msra.mxu0 %v1086_v29  ;;  %v227_v0 = vsub.f32 %v1523_v34, %v1444_v2 }
 0x37e   :  { %1259 = vmatprep.subr.mxu0 %v1085_v38 }
 0x37f   :  { %1260 = vmatpush3.msra.mxu0 %v1085_v38 }
 0x380   :  { %1261 = vmatprep.subr.mxu0 %v1084_v39 }
 0x381   :  { %1262 = vmatpush3.msra.mxu0 %v1084_v39 }
 0x382   :  { %1263 = vmatprep.subr.mxu0 %v1083_v40 }
 0x383   :  { %1264 = vmatpush3.msra.mxu0 %v1083_v40 }
 0x384   :  { %1268 = vmatprep.subr.mxu0 %v1100_v57 }
 0x43c   :  { %v1605_v8 = vpop.f32.mrf.mxu0 }
 0x43d   :  { %v1609_v9 = vsub.f32 %v1521_v33, %v1605_v8  ;;  %v475_v41 = vadd.f32 %v1605_v8, %v1517_v32  ;;  %v454_v1 = vsub.f32 %v1605_v8, %v1521_v33 }
 0x43e   :  { %v1611_v10 = vpop.f32.mrf.mxu0 }
 0x43f   :  { %480 = vst.msk [vmem:[#allocation7 + $0x18] sm:$0xff] %vm34_vm0, %v1609_v9  ;;  %v1617_v11 = vsub.f32 %v1529_v35, %v1611_v10  ;;  %v453_v63 = vsub.f32 %v1611_v10, %v1529_v35  ;;  %v230_v35 = vmul.f32 %v228_v6, %v228_v6 }
 0x441   :  { %479 = vst.msk [vmem:[#allocation7 + $0x10] sm:$0xff] %vm34_vm0, %v1617_v11  ;;  %1235 = vmatprep.mubr.msk.f32.mxu1 %vm34_vm0, %v1617_v11  ;;  %v455_v7 = vmul.f32 %v453_v63, %v453_v63  ;;  %v232_v32 = vsel %vm34_vm0, %v230_v35, 0.0  ;;  %v474_v63 = vadd.f32 %v1611_v10, %v1523_v34 }
 0x442   :  { %1236 = vmatmul.mubr.msk.f32.vlgmr.msra.gmra.mxu1 %vm34_vm0, %v1609_v9 }
 0x443   :  { %1239 = vmatpush3.msra.mxu1 %v1080_v12  ;;  %v456_v12 = vmul.f32 %v454_v1, %v454_v1 }
 0x444   :  { %1240 = vmatprep.subr.mxu1 %v1079_v13 }
 0x445   :  { %1241 = vmatpush3.msra.mxu1 %v1079_v13  ;;  %v458_v8 = vsel %vm34_vm0, %v456_v12, 0.0 }
 0x446   :  { %1242 = vmatprep.subr.mxu1 %v1078_v14 }
 0x447   :  { %1243 = vmatpush3.msra.mxu1 %v1078_v14 }
 0x448   :  { %1244 = vmatprep.subr.mxu1 %v1077_v15 }
 0x449   :  { %1245 = vmatpush3.msra.mxu1 %v1077_v15 }
 0x44a   :  { %1246 = vmatprep.subr.mxu1 %v1076_v16 }
 0x44b   :  { %1247 = vmatpush3.msra.mxu1 %v1076_v16  ;;  %v457_v16 = vsel %vm34_vm0, %v455_v7, 0.0 }
 0x44c   :  { %1248 = vmatprep.subr.mxu1 %v1075_v17  ;;  %v459_v5 = vadd.f32 %v458_v8, %v457_v16 }
 0x44d   :  { %1249 = vmatpush3.msra.mxu1 %v1075_v17 }
 0x44e   :  { %1250 = vmatprep.subr.mxu1 %v1074_v27 }
 0x44f   :  { %1251 = vmatpush3.msra.mxu1 %v1074_v27 }
 0x450   :  { %1252 = vmatprep.subr.mxu1 %v1073_v28 }
 0x451   :  { %1253 = vmatpush3.msra.mxu1 %v1073_v28 }
 0x502   :  { %v1237_v19 = vpop.f32.mrf.mxu1 }
 0x503   :  { %v576_v20 = vadd.f32 %v1237_v19, %v1070_v18  ;;  %v1094_v19 = vld [vmem:[%s1796_s1 + $0xc8] sm:$0xff] }
 0x504   :  { %v558_v21 = vpop.f32.mrf.mxu1 }
 0x505   :  { %v575_v22 = vadd.f32 %v1070_v18, %v558_v21  ;;  %v580_v24 = vsel %vm125_vm1, %v576_v20, inf  ;;  %v1093_v20 = vld [vmem:[%s1796_s1 + $0xc0] sm:$0xff]  ;;  %s1389_s1 = smov [#allocation4]  }
 0x506   :  { %581 = vmin.index.xlane.f32.xlu1 %v580_v24  ;;  %s995_s11 = sshll.u32 %s1389_s1, 4  ;;  %s996_s11 = int_to_ptr.vmem [resolvable:$true] %s995_s11 }
 0x507   :  { %v577_v26 = vsel %vm125_vm1, %v575_v22, inf  ;;  %s1302_s14 = scalar_lea.vmem %s996_s11, 64  ;;  %p1307_p1 = scmp.lt.s32.totalorder %s996_s11, %s996_s11 }
 0x508   :  { %578 = vmin.index.xlane.f32.xlu0 %v577_v26  ;;  %p1303_p0 = scmp.ne.s32.totalorder %s996_s11, %s1302_s14  ;;  %p1308_p2 = scmp.lt.s32.totalorder %s1302_s14, %s1302_s14 }
 0x50a   :  { %p1309_p3 = por %p1308_p2, %p1307_p1 }
 0x50c   :  { %p1310_p4 = pnand %p1309_p3, %p1303_p0 }
 0x58f   :  { %v1657_v30 = vpop.xlane.xlu1 %581 }
 0x590   :  { %vm584_vm8 = vcmp.eq.s32.totalorder %v1494_v23, %v1657_v30  ;;  %v957_v22 = vrot.slane %v1657_v30, %v1574_v54 }
 0x591   :  { %v1661_v31 = vpop.xlane.xlu0 %578  ;;  %v1072_v37 = vsel %vm584_vm8, 1.0, %v1388_v25 }
 0x592   :  { %vm583_vm9 = vcmp.eq.s32.totalorder %v1494_v23, %v1661_v31  ;;  %v953_v21 = vrot.slane %v1661_v31, %v1578_v55 }
 0x593   :  { %v1071_v36 = vsel %vm583_vm9, 1.0, %v1388_v25 }
 0x594   :  { %1254 = vmatprep.mubr.msk.f32.mxu1 %vm125_vm1, %v1071_v36  ;;  %v958_v27 = vsel %vm939_vm5, %v957_v22, %v953_v21 }
 0x595   :  { %1255 = vmatmul.mubr.msk.f32.vlgmr.msra.gmra.mxu1 %vm125_vm1, %v1072_v37  ;;  %v971_v39 = vsel %vm970_vm11, %v1594_v3, %v958_v27 }
 0x655   :  { %v1256_v42 = vpop.f32.mrf.mxu1 }
 0x656   :  { %v680_v43 = vsub.f32 %v1256_v42, %v1609_v9  ;;  %v1681_v44 = vadd.f32 %v1256_v42, %v475_v41  ;;  %v1684_v45 = vsub.f32 %v1609_v9, %v1256_v42 }
 0x657   :  { %v1686_v46 = vpop.f32.mrf.mxu1 }
 0x658   :  { %v682_v47 = vmul.f32 %v680_v43, %v680_v43  ;;  %706 = vst.msk [vmem:[#allocation7 + $0x28] sm:$0xff] %vm34_vm0, %v1684_v45  ;;  %v679_v48 = vsub.f32 %v1686_v46, %v1617_v11  ;;  %v1694_v49 = vsub.f32 %v1617_v11, %v1686_v46  ;;  %v229_v11 = vmul.f32 %v227_v0, %v227_v0 }
 0x659   :  { %v700_v1 = vadd.f32 %v1686_v46, %v474_v63 }
 0x65a   :  { %v681_v50 = vmul.f32 %v679_v48, %v679_v48  ;;  %705 = vst.msk [vmem:[#allocation7 + $0x20] sm:$0xff] %vm34_vm0, %v1694_v49  ;;  %1265 = vmatprep.mubr.msk.f32.mxu0 %vm34_vm0, %v1694_v49  ;;  %v684_v52 = vsel %vm34_vm0, %v682_v47, 0.0  ;;  %v231_v17 = vsel %vm34_vm0, %v229_v11, 0.0 }
 0x65b   :  { %1266 = vmatmul.mubr.msk.f32.vlgmr.msra.gmra.mxu0 %vm34_vm0, %v1684_v45  ;;  %v233_v18 = vadd.f32 %v232_v32, %v231_v17 }
 0x65c   :  { %v683_v51 = vsel %vm34_vm0, %v681_v50, 0.0  ;;  %1269 = vmatpush3.msra.mxu0 %v1100_v57 }
 0x65d   :  { %v685_v56 = vadd.f32 %v684_v52, %v683_v51  ;;  %1270 = vmatprep.subr.mxu0 %v1099_v58 }
 0x65e   :  { %1271 = vmatpush3.msra.mxu0 %v1099_v58 }
 0x65f   :  { %1272 = vmatprep.subr.mxu0 %v1098_v59 }
 0x660   :  { %1273 = vmatpush3.msra.mxu0 %v1098_v59 }
 0x661   :  { %1274 = vmatprep.subr.mxu0 %v1097_v60 }
 0x662   :  { %1275 = vmatpush3.msra.mxu0 %v1097_v60 }
 0x663   :  { %1276 = vmatprep.subr.mxu0 %v1096_v61 }
 0x664   :  { %1277 = vmatpush3.msra.mxu0 %v1096_v61 }
 0x665   :  { %1278 = vmatprep.subr.mxu0 %v1095_v62 }
 0x666   :  { %1279 = vmatpush3.msra.mxu0 %v1095_v62 }
 0x667   :  { %1280 = vmatprep.subr.mxu0 %v1094_v19 }
 0x668   :  { %1281 = vmatpush3.msra.mxu0 %v1094_v19 }
 0x669   :  { %1282 = vmatprep.subr.mxu0 %v1093_v20 }
 0x66a   :  { %1283 = vmatpush3.msra.mxu0 %v1093_v20 }
 0x71b   :  { %v1267_v9 = vpop.f32.mrf.mxu0 }
 0x71c   :  { %v802_v13 = vadd.f32 %v1267_v9, %v1090_v4 }
 0x71d   :  { %v784_v14 = vpop.f32.mrf.mxu0 }
 0x71e   :  { %v801_v15 = vadd.f32 %v1090_v4, %v784_v14  ;;  %v806_v2 = vsel %vm125_vm1, %v802_v13, inf }
 0x71f   :  { %807 = vmin.index.xlane.f32.xlu1 %v806_v2 }
 0x720   :  { %v803_v33 = vsel %vm125_vm1, %v801_v15, inf }
 0x721   :  { %804 = vmin.index.xlane.f32.xlu0 %v803_v33 }
 0x723   :  { %460 = vadd.xlane.f32.xlu1 %v459_v5 }
 0x725   :  { %234 = vadd.xlane.f32.xlu0 %v233_v18 }
 0x729   :  { %686 = vadd.xlane.f32.xlu0 %v685_v56 }
 0x7a8   :  { %v808_v24 = vpop.xlane.xlu1 %807 }
 0x7a9   :  { %vm810_vm10 = vcmp.eq.s32.totalorder %v1494_v23, %v808_v24  ;;  %v966_v28 = vrot.slane %v808_v24, %v1574_v54 }
 0x7aa   :  { %v805_v26 = vpop.xlane.xlu0 %804  ;;  %v1092_v30 = vsel %vm810_vm10, 1.0, %v1388_v25 }
 0x7ab   :  { %vm809_vm12 = vcmp.eq.s32.totalorder %v1494_v23, %v805_v26  ;;  %v962_v29 = vrot.slane %v805_v26, %v1578_v55 }
 0x7ac   :  { %v1091_v36 = vsel %vm809_vm12, 1.0, %v1388_v25  ;;  %v461_v31 = vpop.xlane.xlu1 %460 }
 0x7ad   :  { %v462_v37 = vrot.slane %v461_v31, 4  ;;  %1284 = vmatprep.mubr.msk.f32.mxu0 %vm125_vm1, %v1091_v36  ;;  %v967_v38 = vsel %vm939_vm5, %v966_v28, %v962_v29 }
 0x7ae   :  { %1285 = vmatmul.mubr.msk.f32.vlgmr.msra.gmra.mxu0 %vm125_vm1, %v1092_v30  ;;  %v235_v54 = vpop.xlane.xlu0 %234  ;;  %v973_v40 = vsel %vm972_vm13, %v971_v39, %v967_v38 }
 0x7af   :  { %v463_v41 = vadd.f32 %v462_v37, %v461_v31  ;;  %v236_v55 = vrot.slane %v235_v54, 4  ;;  %975 = vst.msk [vmem:[#allocation4] sm:$0xf] %vm974_vm14, %v973_v40 }
 0x7b1   :  { %v464_v42 = vrot.slane %v463_v41, 2  ;;  %v237_v43 = vadd.f32 %v236_v55, %v235_v54 }
 0x7b2   :  { %v687_v47 = vpop.xlane.xlu0 %686 }
 0x7b3   :  { %v238_v48 = vrot.slane %v237_v43, 2  ;;  %v688_v50 = vrot.slane %v687_v47, 4  ;;  %v465_v25 = vadd.f32 %v464_v42, %v463_v41 }
 0x7b5   :  { %v689_v51 = vadd.f32 %v688_v50, %v687_v47  ;;  %v239_v52 = vadd.f32 %v238_v48, %v237_v43  ;;  %v466_v56 = vrot.slane %v465_v25, 1 }
 0x7b7   :  { %v690_v57 = vrot.slane %v689_v51, 2  ;;  %v240_v58 = vrot.slane %v239_v52, 1  ;;  %v467_v60 = vadd.f32 %v466_v56, %v465_v25 }
 0x7b9   :  { %v691_v59 = vadd.f32 %v690_v57, %v689_v51  ;;  %v241_v3 = vadd.f32 %v240_v58, %v239_v52 }
 0x7bb   :  { %1287 = vpush %v241_v3  ;;  %v692_v61 = vrot.slane %v691_v59, 1 }
 0x7bc   :  { %1289 = vpush %v467_v60 }
 0x7bd   :  { %v693_v62 = vadd.f32 %v692_v61, %v691_v59 }
 0x7bf   :  { %1291 = vpush %v693_v62 }
 0x86e   :  { %v1286_v0 = vpop.f32.mrf.mxu0 }
 0x86f   :  { %v906_v4 = vsub.f32 %v1286_v0, %v1684_v45  ;;  %v927_v6 = vadd.f32 %v1286_v0, %v1681_v44 }
 0x870   :  { %v896_v7 = vpop.f32.mrf.mxu0 }
 0x871   :  { %v908_v9 = vmul.f32 %v906_v4, %v906_v4  ;;  %929 = vst.msk [vmem:[#allocation2 + $0x8] sm:$0xff] %vm34_vm0, %v927_v6  ;;  %v905_v11 = vsub.f32 %v896_v7, %v1694_v49  ;;  %v926_v12 = vadd.f32 %v896_v7, %v700_v1 }
 0x873   :  { %v907_v13 = vmul.f32 %v905_v11, %v905_v11  ;;  %928 = vst.msk [vmem:[#allocation2] sm:$0xff] %vm34_vm0, %v926_v12  ;;  %v910_v34 = vsel %vm34_vm0, %v908_v9, 0.0 }
 0x875   :  { %v909_v14 = vsel %vm34_vm0, %v907_v13, 0.0 }
 0x876   :  { %v911_v10 = vadd.f32 %v910_v34, %v909_v14 }
 0x878   :  { %912 = vadd.xlane.f32.xlu1 %v911_v10 }
 0x879   :  { %1313 = shalt.err (!%p1310_p4)
}
 0x87a   :  { %998 = dma.vmem_to_hbm [thread:$0]  %s996_s11, 64, %s1800_s5, [#allocation5]  }
 0x87b   :  { %s1322_s17 = scalar_lea.vmem %s983_s13, 256  ;;  %p1327_p6 = scmp.lt.s32.totalorder %s983_s13, %s983_s13 }
 0x87c   :  { %p1323_p5 = scmp.ne.s32.totalorder %s983_s13, %s1322_s17  ;;  %p1328_p7 = scmp.lt.s32.totalorder %s1322_s17, %s1322_s17 }
 0x87e   :  { %p1329_p8 = por %p1328_p7, %p1327_p6 }
 0x880   :  { %p1330_p9 = pnand %p1329_p8, %p1323_p5 }
 0x882   :  { %1333 = shalt.err (!%p1330_p9)
}
 0x883   :  { %s1391_s18 = smov 128   ;;  %s1392_s2 = smov 8  }
 0x884   :  { %988 = dma.vmem_to_hbm [thread:$0]  %s983_s13, 256, %s1799_s4, [#allocation3], %s1391_s18, %s1391_s18, %s1392_s2  }
 0x885   :  { %s1393_s20 = smov [#allocation7]  }
 0x886   :  { %s1014_s21 = sshll.u32 %s1393_s20, 4  ;;  %s1015_s21 = int_to_ptr.vmem [resolvable:$true] %s1014_s21 }
 0x887   :  { %s1342_s22 = scalar_lea.vmem %s1015_s21, 768  ;;  %p1347_p11 = scmp.lt.s32.totalorder %s1015_s21, %s1015_s21 }
 0x888   :  { %p1343_p10 = scmp.ne.s32.totalorder %s1015_s21, %s1342_s22  ;;  %p1348_p12 = scmp.lt.s32.totalorder %s1342_s22, %s1342_s22 }
 0x88a   :  { %p1349_p13 = por %p1348_p12, %p1347_p11 }
 0x88c   :  { %p1350_p0 = pnand %p1349_p13, %p1343_p10 }
 0x88e   :  { %1353 = shalt.err (!%p1350_p0)
}
 0x88f   :  { %1020 = dma.vmem_to_hbm [thread:$0]  %s1015_s21, 768, %s1802_s7, [#allocation8], %s1391_s18, %s1391_s18, %s1392_s2   ;;  %vm243_vm15 = vcmp.eq.s32.totalorder %v1571_v53, 0  ;;  %vm244_vm0 = vcmp.eq.s32.totalorder %v1494_v23, 0  ;;  %vm469_vm1 = vcmp.eq.s32.totalorder %v1494_v23, 1  ;;  %vm695_vm3 = vcmp.eq.s32.totalorder %v1494_v23, 2 }
 0x890   :  { %s1288_s4 = spop %1287  ;;  %vm245_vm2 = vmand %vm243_vm15, %vm244_vm0  ;;  %vm921_vm6 = vcmp.eq.s32.totalorder %v1494_v23, 3  ;;  %s1394_s26 = smov [#allocation6]  }
 0x891   :  { %s1290_s24 = spop %1289  ;;  %v246_v16 = vstv %s1288_s4  ;;  %vm470_vm4 = vmand %vm243_vm15, %vm469_vm1  ;;  %s1005_s27 = sshll.u32 %s1394_s26, 4  ;;  %s1006_s27 = int_to_ptr.vmem [resolvable:$true] %s1005_s27 }
 0x892   :  { %s1292_s7 = spop %1291  ;;  %v471_v33 = vstv %s1290_s24  ;;  %vm696_vm5 = vmand %vm243_vm15, %vm695_vm3  ;;  %v247_v17 = vsel %vm245_vm2, %v246_v16, 0.0  ;;  %s1362_s28 = scalar_lea.vmem %s1006_s27, 128 }
 0x893   :  { %v697_v8 = vstv %s1292_s7  ;;  %v472_v5 = vsel %vm470_vm4, %v471_v33, 0.0  ;;  %vm922_vm7 = vmand %vm243_vm15, %vm921_vm6  ;;  %p1363_p1 = scmp.ne.s32.totalorder %s1006_s27, %s1362_s28  ;;  %p1367_p2 = scmp.lt.s32.totalorder %s1006_s27, %s1006_s27 }
 0x894   :  { %v698_v32 = vsel %vm696_vm5, %v697_v8, 0.0  ;;  %v473_v18 = vadd.f32 %v472_v5, %v247_v17  ;;  %p1368_p3 = scmp.lt.s32.totalorder %s1362_s28, %s1362_s28 }
 0x896   :  { %v699_v19 = vadd.f32 %v698_v32, %v473_v18  ;;  %p1369_p4 = por %p1368_p3, %p1367_p2 }
 0x898   :  { %p1370_p5 = pnand %p1369_p4, %p1363_p1 }
 0x901   :  { %v913_v44 = vpop.xlane.xlu1 %912 }
 0x902   :  { %v914_v45 = vrot.slane %v913_v44, 4 }
 0x904   :  { %v915_v46 = vadd.f32 %v914_v45, %v913_v44 }
 0x906   :  { %v916_v49 = vrot.slane %v915_v46, 2 }
 0x908   :  { %v917_v35 = vadd.f32 %v916_v49, %v915_v46 }
 0x90a   :  { %v918_v15 = vrot.slane %v917_v35, 1 }
 0x90c   :  { %v919_v2 = vadd.f32 %v918_v15, %v917_v35 }
 0x90e   :  { %1293 = vpush %v919_v2 }
 0x93f   :  { %s1294_s25 = spop %1293 }
 0x940   :  { %v923_v20 = vstv %s1294_s25 }
 0x941   :  { %v924_v21 = vsel %vm922_vm7, %v923_v20, 0.0 }
 0x942   :  { %v925_v22 = vadd.f32 %v924_v21, %v699_v19 }
 0x944   :  { %976 = vst [vmem:[#allocation6] sm:$0xff] %v925_v22 }
 0x945   :  { %1373 = shalt.err (!%p1370_p5)
}
 0x946   :  { %1008 = dma.vmem_to_hbm [thread:$0]  %s1006_s27, 128, %s1801_s6, [#allocation5]  }
 0x947   :  { %1382 = dma.done.wait [#allocation3], 256  }
 0x948   :  { %1383 = vsyncadd [#allocation3], 4294967040 }
 0x949   :  { %1384 = dma.done.wait [#allocation5], 192  }
 0x94a   :  { %1385 = vsyncadd [#allocation5], 4294967104 }
 0x94b   :  { %1386 = dma.done.wait [#allocation8], 768  }
 0x94c   :  { %1387 = vsyncadd [#allocation8], 4294966528 }
 0x94d   :  { %1033 = vsyncpa [#allocation3], 1 }
 0x94e   :  { %1034 = vsyncpa [#allocation5], 1 }
 0x94f   :  { %1035 = vsyncpa [#allocation8], 1 }

</bundles_post_ra>
